<compile_context>
chip_gen: v5e
topology: v5e:2x2
jax: 0.10.0
libtpu: 0.0.40
codegen_flags: <defaults>
</compile_context>

<pallas_src>
import functools

import jax
import jax.numpy as jnp
import numpy as np
from jax.experimental import pallas as pl
from jax.experimental.pallas import tpu as pltpu


# ----------------------------- Pallas kernels --------------------------------
def _sage_agg_first_kernel(a_ref, xk_ref, xi_ref, wcat_ref, b_ref, o_ref, acc_ref,
                           *, relu):
    """out = concat([A @ X, X_root]) @ [W_l; W_r] + b  (aggregate-then-project)."""
    k = pl.program_id(1)

    @pl.when(k == 0)
    def _init():
        acc_ref[...] = jnp.zeros_like(acc_ref)

    # Accumulate the mean-aggregation matmul over K tiles (MXU, f32 accumulator).
    acc_ref[...] += jnp.dot(a_ref[...], xk_ref[...],
                            preferred_element_type=jnp.float32)

    @pl.when(k == pl.num_programs(1) - 1)
    def _finalize():
        # Fuse lin_l(agg) + lin_r(x) into a single MXU contraction of depth 2*Fp.
        cat = jnp.concatenate([acc_ref[...], xi_ref[...]], axis=1)
        out = jnp.dot(cat, wcat_ref[...],
                      preferred_element_type=jnp.float32) + b_ref[...]
        if relu:
            out = jnp.maximum(out, 0.0)
        o_ref[...] = out.astype(o_ref.dtype)


def _sage_proj_first_kernel(a_ref, xk_ref, xi_ref, wl_ref, wr_ref, b_ref, o_ref,
                            acc_ref, *, relu):
    """out = A @ (X @ W_l) + X_root @ W_r + b  (project-then-aggregate)."""
    k = pl.program_id(1)

    @pl.when(k == 0)
    def _init():
        acc_ref[...] = jnp.zeros_like(acc_ref)

    # Narrow the big A-matmul: project the K-tile of X first (out_dim < in_dim).
    y = jnp.dot(xk_ref[...], wl_ref[...], preferred_element_type=jnp.float32)
    acc_ref[...] += jnp.dot(a_ref[...], y, preferred_element_type=jnp.float32)

    @pl.when(k == pl.num_programs(1) - 1)
    def _finalize():
        out = (acc_ref[...]
               + jnp.dot(xi_ref[...], wr_ref[...],
                         preferred_element_type=jnp.float32)
               + b_ref[...])
        if relu:
            out = jnp.maximum(out, 0.0)
        o_ref[...] = out.astype(o_ref.dtype)


# ------------------------------ Layer wrapper ---------------------------------
_LANE = 128


def _round_up(x, m):
    return ((x + m - 1) // m) * m


def sage_layer(a, x, w_l, w_r, b, *, relu, tile=256):
    """One SAGEConv layer (optionally fused with ReLU) as a tiled Pallas call."""
    n = a.shape[0]
    f = x.shape[1]
    h = w_l.shape[1]

    f_pad = _round_up(f, _LANE)
    h_pad = _round_up(h, _LANE)
    n_pad = _round_up(n, tile)

    # Lane-dense (multiple-of-128) padding for every last dim; row padding to the tile.
    a_p = jnp.pad(a.astype(jnp.float32), ((0, n_pad - n), (0, n_pad - n)))
    x_p = jnp.pad(x.astype(jnp.float32), ((0, n_pad - n), (0, f_pad - f)))
    wl_p = jnp.pad(w_l.astype(jnp.float32), ((0, f_pad - f), (0, h_pad - h)))
    wr_p = jnp.pad(w_r.astype(jnp.float32), ((0, f_pad - f), (0, h_pad - h)))
    b_p = jnp.pad(b.astype(jnp.float32).reshape(1, -1), ((0, 0), (0, h_pad - h)))

    grid = (n_pad // tile, n_pad // tile)

    # Reassociation heuristic from the review: run A against the narrower factor.
    project_first = h < f

    common_specs = [
        pl.BlockSpec((tile, tile), lambda i, k: (i, k)),   # A tile
        pl.BlockSpec((tile, f_pad), lambda i, k: (k, 0)),  # X rows for the reduction
        pl.BlockSpec((tile, f_pad), lambda i, k: (i, 0)),  # X rows for the root term
    ]
    out_spec = pl.BlockSpec((tile, h_pad), lambda i, k: (i, 0))

    acc_width = h_pad if project_first else f_pad
    scratch = [pltpu.VMEM((tile, acc_width), jnp.float32)]

    flops = 2 * n_pad * n_pad * acc_width + 4 * n_pad * f_pad * h_pad
    bytes_accessed = 4 * (n_pad * n_pad + 2 * n_pad * f_pad
                          + 2 * f_pad * h_pad + h_pad + n_pad * h_pad)
    cost = pl.CostEstimate(flops=flops, transcendentals=0,
                           bytes_accessed=bytes_accessed)

    compiler_params = pltpu.CompilerParams(
        dimension_semantics=("parallel", "arbitrary"),
        vmem_limit_bytes=32 * 1024 * 1024,
    )

    if project_first:
        kernel = functools.partial(_sage_proj_first_kernel, relu=relu)
        in_specs = common_specs + [
            pl.BlockSpec((f_pad, h_pad), lambda i, k: (0, 0)),  # W_l
            pl.BlockSpec((f_pad, h_pad), lambda i, k: (0, 0)),  # W_r
            pl.BlockSpec((1, h_pad), lambda i, k: (0, 0)),      # bias
        ]
        operands = (a_p, x_p, x_p, wl_p, wr_p, b_p)
    else:
        kernel = functools.partial(_sage_agg_first_kernel, relu=relu)
        w_cat = jnp.concatenate([wl_p, wr_p], axis=0)           # [2*f_pad, h_pad]
        in_specs = common_specs + [
            pl.BlockSpec((2 * f_pad, h_pad), lambda i, k: (0, 0)),
            pl.BlockSpec((1, h_pad), lambda i, k: (0, 0)),
        ]
        operands = (a_p, x_p, x_p, w_cat, b_p)

    out_p = pl.pallas_call(
        kernel,
        out_shape=jax.ShapeDtypeStruct((n_pad, h_pad), jnp.float32),
        grid=grid,
        in_specs=in_specs,
        out_specs=out_spec,
        scratch_shapes=scratch,
        compiler_params=compiler_params,
        cost_estimate=cost,
    )(*operands)

    return out_p[:n, :h]


# ------------------------------ Model wrapper ---------------------------------
def build_agg_matrix(edge_index, num_nodes):
    """Dense row-normalized aggregation matrix from edge_index [2, E] (src, dst)."""
    src = edge_index[0]
    dst = edge_index[1]
    adj = jnp.zeros((num_nodes, num_nodes), jnp.float32).at[dst, src].add(1.0)
    deg = adj.sum(axis=1, keepdims=True)
    return jnp.where(deg > 0, adj / jnp.maximum(deg, 1.0), 0.0)


def init_params(key, feature_num, hidden, output_num):
    ks = jax.random.split(key, 4)

    def glorot(k, fan_in, fan_out):
        lim = jnp.sqrt(6.0 / (fan_in + fan_out))
        return jax.random.uniform(k, (fan_in, fan_out), jnp.float32, -lim, lim)

    return {
        "w_l1": glorot(ks[0], feature_num, hidden),
        "w_r1": glorot(ks[1], feature_num, hidden),
        "b1": jnp.zeros((1, hidden), jnp.float32),
        "w_l2": glorot(ks[2], hidden, output_num),
        "w_r2": glorot(ks[3], hidden, output_num),
        "b2": jnp.zeros((1, output_num), jnp.float32),
    }


@jax.jit
def sage_model_forward(params, x, a):
    # conv1 + ReLU (fused in kernel); F=4 < hidden=16 -> aggregate-then-project.
    h = sage_layer(a, x, params["w_l1"], params["w_r1"], params["b1"], relu=True)
    # F.dropout(training=False) is the identity in eval mode.
    # conv2; out=8 < hidden=16 -> project-then-aggregate (A @ (h @ W_l2)).
    out = sage_layer(a, h, params["w_l2"], params["w_r2"], params["b2"], relu=False)
    return out


def reference_forward(params, x, a):
    def layer(a, x, wl, wr, b):
        return (a @ x) @ wl + x @ wr + b

    h = jnp.maximum(layer(a, x, params["w_l1"], params["w_r1"], params["b1"]), 0.0)
    return layer(a, h, params["w_l2"], params["w_r2"], params["b2"])


# --------------------------------- Main ----------------------------------------
if __name__ == "__main__":
    N = 8            # number of nodes
    FEATURE_NUM = 4  # input feature dim
    HIDDEN = 16      # SAGEConv1 output dim (fixed to 16 by the module)
    OUTPUT_NUM = 8   # SAGEConv2 output dim

    key = jax.random.PRNGKey(0)
    k_x, k_p = jax.random.split(key)

    # Node features [N, F]
    x = jax.random.normal(k_x, (N, FEATURE_NUM), jnp.float32)

    # Deterministic edge_index [2, E]: bidirectional ring + a couple of chords.
    src = np.array(
        list(range(N)) + [(i + 1) % N for i in range(N)] + [0, 3], dtype=np.int32
    )
    dst = np.array(
        [(i + 1) % N for i in range(N)] + list(range(N)) + [4, 7], dtype=np.int32
    )
    edge_index = jnp.stack([jnp.asarray(src), jnp.asarray(dst)], axis=0)

    a = build_agg_matrix(edge_index, N)
    params = init_params(k_p, FEATURE_NUM, HIDDEN, OUTPUT_NUM)

    out = sage_model_forward(params, x, a)
    out = jax.block_until_ready(out)

    ref = reference_forward(params, x, a)
    np.testing.assert_allclose(np.asarray(out), np.asarray(ref), rtol=1e-4, atol=1e-5)

    print("KERNEL_OK")
</pallas_src>

<mosaic_0001>
module attributes {stable_mosaic.version = 11 : i64} {
  func.func @_sage_agg_first_kernel(%arg0: i32, %arg1: i32, %arg2: memref<256x256xf32, #tpu.memory_space<vmem>>, %arg3: memref<256x128xf32, #tpu.memory_space<vmem>>, %arg4: memref<256x128xf32, #tpu.memory_space<vmem>>, %arg5: memref<256x128xf32, #tpu.memory_space<vmem>>, %arg6: memref<1x128xf32, #tpu.memory_space<vmem>>, %arg7: memref<256x128xf32, #tpu.memory_space<vmem>>, %arg8: memref<256x128xf32, #tpu.memory_space<vmem>>) attributes {dimension_semantics = [#tpu.dimension_semantics<parallel>, #tpu.dimension_semantics<arbitrary>], iteration_bounds = array<i64: 1, 1>, scalar_prefetch = 0 : i64, scratch_operands = 1 : i64, tpu.core_type = #tpu.core_type<tc>, window_params = [{transform_indices = @transform_0, window_bounds = array<i64: 256, 256>}, {transform_indices = @transform_1, window_bounds = array<i64: 256, 128>}, {transform_indices = @transform_2, window_bounds = array<i64: 256, 128>}, {pipeline_mode = #tpu.pipeline_mode<synchronous>, transform_indices = @transform_3, window_bounds = array<i64: 256, 128>}, {pipeline_mode = #tpu.pipeline_mode<synchronous>, transform_indices = @transform_4, window_bounds = array<i64: 1, 128>}, {transform_indices = @transform_5, window_bounds = array<i64: 256, 128>}]} {
    %c0_i32 = arith.constant 0 : i32
    %0 = arith.cmpi eq, %arg1, %c0_i32 : i32
    %1 = arith.extui %0 : i1 to i32
    %c0_i32_0 = arith.constant 0 : i32
    %2 = arith.cmpi ne, %1, %c0_i32_0 : i32
    scf.if %2 {
      %cst_10 = arith.constant 0.000000e+00 : f32
      %12 = vector.broadcast %cst_10 : f32 to vector<256x128xf32>
      %c0_11 = arith.constant 0 : index
      %c0_12 = arith.constant 0 : index
      %13 = vector.load %arg8[%c0_11, %c0_12] : memref<256x128xf32, #tpu.memory_space<vmem>>, vector<256x128xf32>
      tpu.vector_store %arg8[%c0_11, %c0_12], %12 {strides = array<i32>} : memref<256x128xf32, #tpu.memory_space<vmem>>, vector<256x128xf32>,
    } else {
    }
    %c0 = arith.constant 0 : index
    %c0_1 = arith.constant 0 : index
    %3 = vector.load %arg8[%c0, %c0_1] : memref<256x128xf32, #tpu.memory_space<vmem>>, vector<256x128xf32>
    %c0_2 = arith.constant 0 : index
    %c0_3 = arith.constant 0 : index
    %4 = vector.load %arg2[%c0_2, %c0_3] : memref<256x256xf32, #tpu.memory_space<vmem>>, vector<256x256xf32>
    %c0_4 = arith.constant 0 : index
    %c0_5 = arith.constant 0 : index
    %5 = vector.load %arg3[%c0_4, %c0_5] : memref<256x128xf32, #tpu.memory_space<vmem>>, vector<256x128xf32>
    %cst = arith.constant dense<0.000000e+00> : vector<256x128xf32>
    %6 = tpu.matmul %4, %5, %cst {dimension_numbers = #tpu.dot_dimension_numbers<[1], [0], [0], [1], [0, 0, 1, 1], [], []>} : vector<256x256xf32>, vector<256x128xf32>, vector<256x128xf32> -> vector<256x128xf32>
    %7 = arith.addf %3, %6 : vector<256x128xf32>
    %c0_6 = arith.constant 0 : index
    %c0_7 = arith.constant 0 : index
    %8 = vector.load %arg8[%c0_6, %c0_7] : memref<256x128xf32, #tpu.memory_space<vmem>>, vector<256x128xf32>
    tpu.vector_store %arg8[%c0_6, %c0_7], %7 {strides = array<i32>} : memref<256x128xf32, #tpu.memory_space<vmem>>, vector<256x128xf32>,
    %c0_i32_8 = arith.constant 0 : i32
    %9 = arith.cmpi eq, %arg1, %c0_i32_8 : i32
    %10 = arith.extui %9 : i1 to i32
    %c0_i32_9 = arith.constant 0 : i32
    %11 = arith.cmpi ne, %10, %c0_i32_9 : i32
    scf.if %11 {
      %c0_10 = arith.constant 0 : index
      %c0_11 = arith.constant 0 : index
      %12 = vector.load %arg8[%c0_10, %c0_11] : memref<256x128xf32, #tpu.memory_space<vmem>>, vector<256x128xf32>
      %c0_12 = arith.constant 0 : index
      %c0_13 = arith.constant 0 : index
      %13 = vector.load %arg4[%c0_12, %c0_13] : memref<256x128xf32, #tpu.memory_space<vmem>>, vector<256x128xf32>
      %14 = tpu.concatenate %12, %13 in 1 : vector<256x128xf32>, vector<256x128xf32> -> vector<256x256xf32>
      %c0_14 = arith.constant 0 : index
      %c0_15 = arith.constant 0 : index
      %15 = vector.load %arg5[%c0_14, %c0_15] : memref<256x128xf32, #tpu.memory_space<vmem>>, vector<256x128xf32>
      %cst_16 = arith.constant dense<0.000000e+00> : vector<256x128xf32>
      %16 = tpu.matmul %14, %15, %cst_16 {dimension_numbers = #tpu.dot_dimension_numbers<[1], [0], [0], [1], [0, 0, 1, 1], [], []>} : vector<256x256xf32>, vector<256x128xf32>, vector<256x128xf32> -> vector<256x128xf32>
      %c0_17 = arith.constant 0 : index
      %c0_18 = arith.constant 0 : index
      %17 = vector.load %arg6[%c0_17, %c0_18] : memref<1x128xf32, #tpu.memory_space<vmem>>, vector<1x128xf32>
      %18 = vector.broadcast %17 : vector<1x128xf32> to vector<256x128xf32>
      %19 = arith.addf %16, %18 : vector<256x128xf32>
      %cst_19 = arith.constant 0.000000e+00 : f32
      %20 = vector.broadcast %cst_19 : f32 to vector<256x128xf32>
      %21 = arith.maximumf %19, %20 : vector<256x128xf32>
      %c0_20 = arith.constant 0 : index
      %c0_21 = arith.constant 0 : index
      %22 = vector.load %arg7[%c0_20, %c0_21] : memref<256x128xf32, #tpu.memory_space<vmem>>, vector<256x128xf32>
      tpu.vector_store %arg7[%c0_20, %c0_21], %21 {strides = array<i32>} : memref<256x128xf32, #tpu.memory_space<vmem>>, vector<256x128xf32>,
    } else {
    }
    return
  }
  func.func @transform_0(%arg0: i32, %arg1: i32) -> (i32, i32) {
    %c0_i32 = arith.constant 0 : i32
    return %arg0, %arg1 : i32, i32
  }
  func.func @transform_1(%arg0: i32, %arg1: i32) -> (i32, i32) {
    %c0_i32 = arith.constant 0 : i32
    %c0_i32_0 = arith.constant 0 : i32
    return %arg1, %c0_i32 : i32, i32
  }
  func.func @transform_2(%arg0: i32, %arg1: i32) -> (i32, i32) {
    %c0_i32 = arith.constant 0 : i32
    %c0_i32_0 = arith.constant 0 : i32
    return %arg0, %c0_i32 : i32, i32
  }
  func.func @transform_3(%arg0: i32, %arg1: i32) -> (i32, i32) {
    %c0_i32 = arith.constant 0 : i32
    %c0_i32_0 = arith.constant 0 : i32
    %c0_i32_1 = arith.constant 0 : i32
    return %c0_i32, %c0_i32_0 : i32, i32
  }
  func.func @transform_4(%arg0: i32, %arg1: i32) -> (i32, i32) {
    %c0_i32 = arith.constant 0 : i32
    %c0_i32_0 = arith.constant 0 : i32
    %c0_i32_1 = arith.constant 0 : i32
    return %c0_i32, %c0_i32_0 : i32, i32
  }
  func.func @transform_5(%arg0: i32, %arg1: i32) -> (i32, i32) {
    %c0_i32 = arith.constant 0 : i32
    %c0_i32_0 = arith.constant 0 : i32
    return %arg0, %c0_i32 : i32, i32
  }
}

module attributes {stable_mosaic.version = 11 : i64} {
  func.func @_sage_proj_first_kernel(%arg0: i32, %arg1: i32, %arg2: memref<256x256xf32, #tpu.memory_space<vmem>>, %arg3: memref<256x128xf32, #tpu.memory_space<vmem>>, %arg4: memref<256x128xf32, #tpu.memory_space<vmem>>, %arg5: memref<128x128xf32, #tpu.memory_space<vmem>>, %arg6: memref<128x128xf32, #tpu.memory_space<vmem>>, %arg7: memref<1x128xf32, #tpu.memory_space<vmem>>, %arg8: memref<256x128xf32, #tpu.memory_space<vmem>>, %arg9: memref<256x128xf32, #tpu.memory_space<vmem>>) attributes {dimension_semantics = [#tpu.dimension_semantics<parallel>, #tpu.dimension_semantics<arbitrary>], iteration_bounds = array<i64: 1, 1>, scalar_prefetch = 0 : i64, scratch_operands = 1 : i64, tpu.core_type = #tpu.core_type<tc>, window_params = [{transform_indices = @transform_0, window_bounds = array<i64: 256, 256>}, {transform_indices = @transform_1, window_bounds = array<i64: 256, 128>}, {transform_indices = @transform_2, window_bounds = array<i64: 256, 128>}, {pipeline_mode = #tpu.pipeline_mode<synchronous>, transform_indices = @transform_3, window_bounds = array<i64: 128, 128>}, {pipeline_mode = #tpu.pipeline_mode<synchronous>, transform_indices = @transform_4, window_bounds = array<i64: 128, 128>}, {pipeline_mode = #tpu.pipeline_mode<synchronous>, transform_indices = @transform_5, window_bounds = array<i64: 1, 128>}, {transform_indices = @transform_6, window_bounds = array<i64: 256, 128>}]} {
    %c0_i32 = arith.constant 0 : i32
    %0 = arith.cmpi eq, %arg1, %c0_i32 : i32
    %1 = arith.extui %0 : i1 to i32
    %c0_i32_0 = arith.constant 0 : i32
    %2 = arith.cmpi ne, %1, %c0_i32_0 : i32
    scf.if %2 {
      %cst_13 = arith.constant 0.000000e+00 : f32
      %14 = vector.broadcast %cst_13 : f32 to vector<256x128xf32>
      %c0_14 = arith.constant 0 : index
      %c0_15 = arith.constant 0 : index
      %15 = vector.load %arg9[%c0_14, %c0_15] : memref<256x128xf32, #tpu.memory_space<vmem>>, vector<256x128xf32>
      tpu.vector_store %arg9[%c0_14, %c0_15], %14 {strides = array<i32>} : memref<256x128xf32, #tpu.memory_space<vmem>>, vector<256x128xf32>,
    } else {
    }
    %c0 = arith.constant 0 : index
    %c0_1 = arith.constant 0 : index
    %3 = vector.load %arg3[%c0, %c0_1] : memref<256x128xf32, #tpu.memory_space<vmem>>, vector<256x128xf32>
    %c0_2 = arith.constant 0 : index
    %c0_3 = arith.constant 0 : index
    %4 = vector.load %arg5[%c0_2, %c0_3] : memref<128x128xf32, #tpu.memory_space<vmem>>, vector<128x128xf32>
    %cst = arith.constant dense<0.000000e+00> : vector<256x128xf32>
    %5 = tpu.matmul %3, %4, %cst {dimension_numbers = #tpu.dot_dimension_numbers<[1], [0], [0], [1], [0, 0, 1, 1], [], []>} : vector<256x128xf32>, vector<128x128xf32>, vector<256x128xf32> -> vector<256x128xf32>
    %c0_4 = arith.constant 0 : index
    %c0_5 = arith.constant 0 : index
    %6 = vector.load %arg9[%c0_4, %c0_5] : memref<256x128xf32, #tpu.memory_space<vmem>>, vector<256x128xf32>
    %c0_6 = arith.constant 0 : index
    %c0_7 = arith.constant 0 : index
    %7 = vector.load %arg2[%c0_6, %c0_7] : memref<256x256xf32, #tpu.memory_space<vmem>>, vector<256x256xf32>
    %cst_8 = arith.constant dense<0.000000e+00> : vector<256x128xf32>
    %8 = tpu.matmul %7, %5, %cst_8 {dimension_numbers = #tpu.dot_dimension_numbers<[1], [0], [0], [1], [0, 0, 1, 1], [], []>} : vector<256x256xf32>, vector<256x128xf32>, vector<256x128xf32> -> vector<256x128xf32>
    %9 = arith.addf %6, %8 : vector<256x128xf32>
    %c0_9 = arith.constant 0 : index
    %c0_10 = arith.constant 0 : index
    %10 = vector.load %arg9[%c0_9, %c0_10] : memref<256x128xf32, #tpu.memory_space<vmem>>, vector<256x128xf32>
    tpu.vector_store %arg9[%c0_9, %c0_10], %9 {strides = array<i32>} : memref<256x128xf32, #tpu.memory_space<vmem>>, vector<256x128xf32>,
    %c0_i32_11 = arith.constant 0 : i32
    %11 = arith.cmpi eq, %arg1, %c0_i32_11 : i32
    %12 = arith.extui %11 : i1 to i32
    %c0_i32_12 = arith.constant 0 : i32
    %13 = arith.cmpi ne, %12, %c0_i32_12 : i32
    scf.if %13 {
      %c0_13 = arith.constant 0 : index
      %c0_14 = arith.constant 0 : index
      %14 = vector.load %arg9[%c0_13, %c0_14] : memref<256x128xf32, #tpu.memory_space<vmem>>, vector<256x128xf32>
      %c0_15 = arith.constant 0 : index
      %c0_16 = arith.constant 0 : index
      %15 = vector.load %arg4[%c0_15, %c0_16] : memref<256x128xf32, #tpu.memory_space<vmem>>, vector<256x128xf32>
      %c0_17 = arith.constant 0 : index
      %c0_18 = arith.constant 0 : index
      %16 = vector.load %arg6[%c0_17, %c0_18] : memref<128x128xf32, #tpu.memory_space<vmem>>, vector<128x128xf32>
      %cst_19 = arith.constant dense<0.000000e+00> : vector<256x128xf32>
      %17 = tpu.matmul %15, %16, %cst_19 {dimension_numbers = #tpu.dot_dimension_numbers<[1], [0], [0], [1], [0, 0, 1, 1], [], []>} : vector<256x128xf32>, vector<128x128xf32>, vector<256x128xf32> -> vector<256x128xf32>
      %18 = arith.addf %14, %17 : vector<256x128xf32>
      %c0_20 = arith.constant 0 : index
      %c0_21 = arith.constant 0 : index
      %19 = vector.load %arg7[%c0_20, %c0_21] : memref<1x128xf32, #tpu.memory_space<vmem>>, vector<1x128xf32>
      %20 = vector.broadcast %19 : vector<1x128xf32> to vector<256x128xf32>
      %21 = arith.addf %18, %20 : vector<256x128xf32>
      %c0_22 = arith.constant 0 : index
      %c0_23 = arith.constant 0 : index
      %22 = vector.load %arg8[%c0_22, %c0_23] : memref<256x128xf32, #tpu.memory_space<vmem>>, vector<256x128xf32>
      tpu.vector_store %arg8[%c0_22, %c0_23], %21 {strides = array<i32>} : memref<256x128xf32, #tpu.memory_space<vmem>>, vector<256x128xf32>,
    } else {
    }
    return
  }
  func.func @transform_0(%arg0: i32, %arg1: i32) -> (i32, i32) {
    %c0_i32 = arith.constant 0 : i32
    return %arg0, %arg1 : i32, i32
  }
  func.func @transform_1(%arg0: i32, %arg1: i32) -> (i32, i32) {
    %c0_i32 = arith.constant 0 : i32
    %c0_i32_0 = arith.constant 0 : i32
    return %arg1, %c0_i32 : i32, i32
  }
  func.func @transform_2(%arg0: i32, %arg1: i32) -> (i32, i32) {
    %c0_i32 = arith.constant 0 : i32
    %c0_i32_0 = arith.constant 0 : i32
    return %arg0, %c0_i32 : i32, i32
  }
  func.func @transform_3(%arg0: i32, %arg1: i32) -> (i32, i32) {
    %c0_i32 = arith.constant 0 : i32
    %c0_i32_0 = arith.constant 0 : i32
    %c0_i32_1 = arith.constant 0 : i32
    return %c0_i32, %c0_i32_0 : i32, i32
  }
  func.func @transform_4(%arg0: i32, %arg1: i32) -> (i32, i32) {
    %c0_i32 = arith.constant 0 : i32
    %c0_i32_0 = arith.constant 0 : i32
    %c0_i32_1 = arith.constant 0 : i32
    return %c0_i32, %c0_i32_0 : i32, i32
  }
  func.func @transform_5(%arg0: i32, %arg1: i32) -> (i32, i32) {
    %c0_i32 = arith.constant 0 : i32
    %c0_i32_0 = arith.constant 0 : i32
    %c0_i32_1 = arith.constant 0 : i32
    return %c0_i32, %c0_i32_0 : i32, i32
  }
  func.func @transform_6(%arg0: i32, %arg1: i32) -> (i32, i32) {
    %c0_i32 = arith.constant 0 : i32
    %c0_i32_0 = arith.constant 0 : i32
    return %arg0, %c0_i32 : i32, i32
  }
}

</mosaic_0001>

<bundles_post_ra>
// kernel: sage_model_forward.2
= control target key start
LH: loop header
LB: loop body
LE: loop exit
PB: predicated region body
PF: predicated region fallthrough
CT: control target
= control target key end

     0   :  { %s1515_s1 = inlined_call_operand.vmem [shape: f32[256,128], index: 1, kind: input, shape index: {}, may-alias: {1,2}]   ;;  %s1516_s0 = inlined_call_operand.vmem [shape: f32[256,256], index: 0, kind: input, shape index: {}]   ;;  %s1517_s3 = inlined_call_operand.vmem [shape: f32[256,128], index: 3, kind: input, shape index: {}]   ;;  %s1518_s2 = inlined_call_operand.vmem [shape: f32[256,128], index: 2, kind: input, shape index: {}, may-alias: {1,2}]   ;;  %s1519_s4 = inlined_call_operand.vmem [shape: f32[1,128], index: 4, kind: input, shape index: {}]   ;;  %s1520_s5 = inlined_call_operand.vmem [shape: f32[256,128], index: 5, kind: output, shape index: {}]  }
   0x1   :  { %v167_v0 = vld [vmem:[%s1515_s1 + $0x78] sm:$0xff]  ;;  %v166_v2 = vld [vmem:[%s1515_s1 + $0x70] sm:$0xff]  ;;  %v165_v4 = vld [vmem:[%s1515_s1 + $0x68] sm:$0xff] }
   0x2   :  { %v183_v1 = vld [vmem:[%s1515_s1 + $0xf8] sm:$0xff]  ;;  %184 = vmatpush.msra.mxu0 %v167_v0  ;;  %v182_v3 = vld [vmem:[%s1515_s1 + $0xf0] sm:$0xff]  ;;  %v181_v5 = vld [vmem:[%s1515_s1 + $0xe8] sm:$0xff] }
   0x3   :  { %297 = vmatpush.msra.mxu1 %v183_v1  ;;  %v164_v6 = vld [vmem:[%s1515_s1 + $0x60] sm:$0xff]  ;;  %v163_v8 = vld [vmem:[%s1515_s1 + $0x58] sm:$0xff]  ;;  %v162_v10 = vld [vmem:[%s1515_s1 + $0x50] sm:$0xff] }
   0x4   :  { %185 = vmatpush.msra.mxu0 %v166_v2  ;;  %v180_v7 = vld [vmem:[%s1515_s1 + $0xe0] sm:$0xff]  ;;  %v179_v9 = vld [vmem:[%s1515_s1 + $0xd8] sm:$0xff]  ;;  %v178_v11 = vld [vmem:[%s1515_s1 + $0xd0] sm:$0xff] }
   0x5   :  { %298 = vmatpush.msra.mxu1 %v182_v3  ;;  %v161_v12 = vld [vmem:[%s1515_s1 + $0x48] sm:$0xff]  ;;  %v160_v14 = vld [vmem:[%s1515_s1 + $0x40] sm:$0xff]  ;;  %v159_v16 = vld [vmem:[%s1515_s1 + $0x38] sm:$0xff] }
   0x6   :  { %186 = vmatpush.msra.mxu0 %v165_v4  ;;  %v177_v13 = vld [vmem:[%s1515_s1 + $0xc8] sm:$0xff]  ;;  %v176_v15 = vld [vmem:[%s1515_s1 + $0xc0] sm:$0xff]  ;;  %v175_v17 = vld [vmem:[%s1515_s1 + $0xb8] sm:$0xff] }
   0x7   :  { %299 = vmatpush.msra.mxu1 %v181_v5  ;;  %v158_v18 = vld [vmem:[%s1515_s1 + $0x30] sm:$0xff]  ;;  %v157_v20 = vld [vmem:[%s1515_s1 + $0x28] sm:$0xff]  ;;  %v156_v22 = vld [vmem:[%s1515_s1 + $0x20] sm:$0xff] }
   0x8   :  { %187 = vmatpush.msra.mxu0 %v164_v6  ;;  %v174_v19 = vld [vmem:[%s1515_s1 + $0xb0] sm:$0xff]  ;;  %v173_v21 = vld [vmem:[%s1515_s1 + $0xa8] sm:$0xff]  ;;  %v172_v23 = vld [vmem:[%s1515_s1 + $0xa0] sm:$0xff] }
   0x9   :  { %300 = vmatpush.msra.mxu1 %v180_v7  ;;  %v155_v24 = vld [vmem:[%s1515_s1 + $0x18] sm:$0xff]  ;;  %v154_v26 = vld [vmem:[%s1515_s1 + $0x10] sm:$0xff]  ;;  %v153_v28 = vld [vmem:[%s1515_s1 + $0x8] sm:$0xff] }
   0xa   :  { %188 = vmatpush.msra.mxu0 %v163_v8  ;;  %v171_v25 = vld [vmem:[%s1515_s1 + $0x98] sm:$0xff]  ;;  %v170_v27 = vld [vmem:[%s1515_s1 + $0x90] sm:$0xff]  ;;  %v169_v29 = vld [vmem:[%s1515_s1 + $0x88] sm:$0xff] }
   0xb   :  { %301 = vmatpush.msra.mxu1 %v179_v9  ;;  %v152_v30 = vld [vmem:[%s1515_s1] sm:$0xff]  ;;  %v89_v33 = vld [vmem:[%s1516_s0 + $0x8] sm:$0xff]  ;;  %v90_v34 = vld [vmem:[%s1516_s0 + $0x10] sm:$0xff] }
   0xc   :  { %189 = vmatpush.msra.mxu0 %v162_v10  ;;  %v168_v31 = vld [vmem:[%s1515_s1 + $0x80] sm:$0xff]  ;;  %v91_v35 = vld [vmem:[%s1516_s0 + $0x18] sm:$0xff]  ;;  %v93_v37 = vld [vmem:[%s1516_s0 + $0x28] sm:$0xff] }
   0xd   :  { %302 = vmatpush.msra.mxu1 %v178_v11  ;;  %v88_v32 = vld [vmem:[%s1516_s0] sm:$0xff]  ;;  %v94_v38 = vld [vmem:[%s1516_s0 + $0x30] sm:$0xff]  ;;  %v95_v39 = vld [vmem:[%s1516_s0 + $0x38] sm:$0xff] }
   0xe   :  { %190 = vmatpush.msra.mxu0 %v161_v12  ;;  %v92_v36 = vld [vmem:[%s1516_s0 + $0x20] sm:$0xff]  ;;  %v97_v41 = vld [vmem:[%s1516_s0 + $0x48] sm:$0xff]  ;;  %v98_v42 = vld [vmem:[%s1516_s0 + $0x50] sm:$0xff] }
   0xf   :  { %303 = vmatpush.msra.mxu1 %v177_v13  ;;  %v96_v40 = vld [vmem:[%s1516_s0 + $0x40] sm:$0xff]  ;;  %v99_v43 = vld [vmem:[%s1516_s0 + $0x58] sm:$0xff]  ;;  %v101_v45 = vld [vmem:[%s1516_s0 + $0x68] sm:$0xff] }
  0x10   :  { %191 = vmatpush.msra.mxu0 %v160_v14  ;;  %v100_v44 = vld [vmem:[%s1516_s0 + $0x60] sm:$0xff]  ;;  %v102_v46 = vld [vmem:[%s1516_s0 + $0x70] sm:$0xff]  ;;  %v103_v47 = vld [vmem:[%s1516_s0 + $0x78] sm:$0xff] }
  0x11   :  { %304 = vmatpush.msra.mxu1 %v176_v15  ;;  %v104_v48 = vld [vmem:[%s1516_s0 + $0x80] sm:$0xff]  ;;  %v105_v49 = vld [vmem:[%s1516_s0 + $0x88] sm:$0xff]  ;;  %v556_v50 = vld [vmem:[%s1517_s3 + $0x78] sm:$0xff] }
  0x12   :  { %192 = vmatpush.msra.mxu0 %v159_v16  ;;  %v555_v51 = vld [vmem:[%s1517_s3 + $0x70] sm:$0xff]  ;;  %v572_v52 = vld [vmem:[%s1517_s3 + $0xf8] sm:$0xff]  ;;  %577 = vmatpush.msra.mxu2 %v556_v50  ;;  %v554_v54 = vld [vmem:[%s1517_s3 + $0x68] sm:$0xff] }
  0x13   :  { %305 = vmatpush.msra.mxu1 %v175_v17  ;;  %690 = vmatpush.msra.mxu3 %v572_v52  ;;  %v571_v53 = vld [vmem:[%s1517_s3 + $0xf0] sm:$0xff]  ;;  %v570_v55 = vld [vmem:[%s1517_s3 + $0xe8] sm:$0xff]  ;;  %v553_v56 = vld [vmem:[%s1517_s3 + $0x60] sm:$0xff] }
  0x14   :  { %193 = vmatpush.msra.mxu0 %v158_v18  ;;  %578 = vmatpush.msra.mxu2 %v555_v51  ;;  %v106_v57 = vld [vmem:[%s1516_s0 + $0x90] sm:$0xff]  ;;  %v107_v58 = vld [vmem:[%s1516_s0 + $0x98] sm:$0xff]  ;;  %v569_v60 = vld [vmem:[%s1517_s3 + $0xe0] sm:$0xff] }
  0x15   :  { %306 = vmatpush.msra.mxu1 %v174_v19  ;;  %691 = vmatpush.msra.mxu3 %v571_v53  ;;  %v552_v59 = vld [vmem:[%s1517_s3 + $0x58] sm:$0xff]  ;;  %v551_v61 = vld [vmem:[%s1517_s3 + $0x50] sm:$0xff]  ;;  %v550_v63 = vld [vmem:[%s1517_s3 + $0x48] sm:$0xff] }
  0x16   :  { %194 = vmatpush.msra.mxu0 %v157_v20  ;;  %579 = vmatpush.msra.mxu2 %v554_v54  ;;  %v568_v62 = vld [vmem:[%s1517_s3 + $0xd8] sm:$0xff]  ;;  %v567_v0 = vld [vmem:[%s1517_s3 + $0xd0] sm:$0xff]  ;;  %v549_v1 = vld [vmem:[%s1517_s3 + $0x40] sm:$0xff] }
  0x17   :  { %307 = vmatpush.msra.mxu1 %v173_v21  ;;  %692 = vmatpush.msra.mxu3 %v570_v55  ;;  %v566_v2 = vld [vmem:[%s1517_s3 + $0xc8] sm:$0xff]  ;;  %v108_v3 = vld [vmem:[%s1516_s0 + $0xa0] sm:$0xff]  ;;  %v548_v5 = vld [vmem:[%s1517_s3 + $0x38] sm:$0xff] }
  0x18   :  { %195 = vmatpush.msra.mxu0 %v156_v22  ;;  %580 = vmatpush.msra.mxu2 %v553_v56  ;;  %v109_v4 = vld [vmem:[%s1516_s0 + $0xa8] sm:$0xff]  ;;  %v565_v6 = vld [vmem:[%s1517_s3 + $0xc0] sm:$0xff]  ;;  %v547_v7 = vld [vmem:[%s1517_s3 + $0x30] sm:$0xff] }
  0x19   :  { %308 = vmatpush.msra.mxu1 %v172_v23  ;;  %693 = vmatpush.msra.mxu3 %v569_v60  ;;  %v564_v8 = vld [vmem:[%s1517_s3 + $0xb8] sm:$0xff]  ;;  %v546_v9 = vld [vmem:[%s1517_s3 + $0x28] sm:$0xff]  ;;  %v563_v10 = vld [vmem:[%s1517_s3 + $0xb0] sm:$0xff] }
  0x1a   :  { %196 = vmatpush.msra.mxu0 %v155_v24  ;;  %581 = vmatpush.msra.mxu2 %v552_v59  ;;  %v545_v11 = vld [vmem:[%s1517_s3 + $0x20] sm:$0xff]  ;;  %v562_v12 = vld [vmem:[%s1517_s3 + $0xa8] sm:$0xff]  ;;  %v110_v13 = vld [vmem:[%s1516_s0 + $0xb0] sm:$0xff] }
  0x1b   :  { %309 = vmatpush.msra.mxu1 %v171_v25  ;;  %694 = vmatpush.msra.mxu3 %v568_v62  ;;  %v111_v14 = vld [vmem:[%s1516_s0 + $0xb8] sm:$0xff]  ;;  %v561_v16 = vld [vmem:[%s1517_s3 + $0xa0] sm:$0xff]  ;;  %v543_v17 = vld [vmem:[%s1517_s3 + $0x10] sm:$0xff] }
  0x1c   :  { %197 = vmatpush.msra.mxu0 %v154_v26  ;;  %582 = vmatpush.msra.mxu2 %v551_v61  ;;  %v544_v15 = vld [vmem:[%s1517_s3 + $0x18] sm:$0xff]  ;;  %v112_v19 = vld [vmem:[%s1516_s0 + $0xc0] sm:$0xff]  ;;  %v542_v20 = vld [vmem:[%s1517_s3 + $0x8] sm:$0xff] }
  0x1d   :  { %310 = vmatpush.msra.mxu1 %v170_v27  ;;  %695 = vmatpush.msra.mxu3 %v567_v0  ;;  %v560_v18 = vld [vmem:[%s1517_s3 + $0x98] sm:$0xff]  ;;  %v559_v21 = vld [vmem:[%s1517_s3 + $0x90] sm:$0xff]  ;;  %v113_v22 = vld [vmem:[%s1516_s0 + $0xc8] sm:$0xff] }
  0x1e   :  { %198 = vmatpush.msra.mxu0 %v153_v28  ;;  %583 = vmatpush.msra.mxu2 %v550_v63  ;;  %v541_v23 = vld [vmem:[%s1517_s3] sm:$0xff]  ;;  %v558_v24 = vld [vmem:[%s1517_s3 + $0x88] sm:$0xff]  ;;  %v114_v27 = vld [vmem:[%s1516_s0 + $0xd0] sm:$0xff] }
  0x1f   :  { %311 = vmatpush.msra.mxu1 %v169_v29  ;;  %696 = vmatpush.msra.mxu3 %v566_v2  ;;  %v557_v25 = vld [vmem:[%s1517_s3 + $0x80] sm:$0xff]  ;;  %v115_v28 = vld [vmem:[%s1516_s0 + $0xd8] sm:$0xff]  ;;  %v510_v29 = vld [vmem:[%s1518_s2 + $0x8] sm:$0xff] }
  0x20   :  { %199 = vmatpush.msra.mxu0 %v152_v30  ;;  %584 = vmatpush.msra.mxu2 %v549_v1  ;;  %v509_v26 = vld [vmem:[%s1518_s2] sm:$0xff]  ;;  %v125_v51 = vld [vmem:[%s1516_s0 + $0x128] sm:$0xff]  ;;  %v515_v53 = vld [vmem:[%s1518_s2 + $0x30] sm:$0xff] }
  0x21   :  { %312 = vmatpush.msra.mxu1 %v168_v31  ;;  %200 = vmatmul.f32.vlgmr.msra.gmra.mxu0 %v88_v32  ;;  %v116_v30 = vld [vmem:[%s1516_s0 + $0xe0] sm:$0xff]  ;;  %v117_v31 = vld [vmem:[%s1516_s0 + $0xe8] sm:$0xff]  ;;  %v511_v32 = vld [vmem:[%s1518_s2 + $0x10] sm:$0xff] }
  0x22   :  { %313 = vmatmul.f32.vlgmr.msra.gmra.mxu1 %v89_v33  ;;  %585 = vmatpush.msra.mxu2 %v548_v5  ;;  %v118_v33 = vld [vmem:[%s1516_s0 + $0xf0] sm:$0xff]  ;;  %v124_v50 = vld [vmem:[%s1516_s0 + $0x120] sm:$0xff]  ;;  %v516_v59 = vld [vmem:[%s1518_s2 + $0x38] sm:$0xff] }
  0x23   :  { %697 = vmatpush.msra.mxu3 %v565_v6  ;;  %v126_v56 = vld [vmem:[%s1516_s0 + $0x130] sm:$0xff]  ;;  %v128_v62 = vld [vmem:[%s1516_s0 + $0x140] sm:$0xff]  ;;  %v129_v63 = vld [vmem:[%s1516_s0 + $0x148] sm:$0xff] }
  0x24   :  { %586 = vmatpush.msra.mxu2 %v547_v7  ;;  %v517_v1 = vld [vmem:[%s1518_s2 + $0x40] sm:$0xff]  ;;  %v131_v5 = vld [vmem:[%s1516_s0 + $0x158] sm:$0xff]  ;;  %v518_v7 = vld [vmem:[%s1518_s2 + $0x48] sm:$0xff] }
  0x25   :  { %698 = vmatpush.msra.mxu3 %v564_v8 }
  0x26   :  { %587 = vmatpush.msra.mxu2 %v546_v9 }
  0x27   :  { %699 = vmatpush.msra.mxu3 %v563_v10  ;;  %v132_v10 = vld [vmem:[%s1516_s0 + $0x160] sm:$0xff] }
  0x28   :  { %588 = vmatpush.msra.mxu2 %v545_v11  ;;  %v133_v11 = vld [vmem:[%s1516_s0 + $0x168] sm:$0xff] }
  0x29   :  { %203 = vmatmul.f32.gmra.mxu0 %v90_v34  ;;  %700 = vmatpush.msra.mxu3 %v562_v12  ;;  %v119_v34 = vld [vmem:[%s1516_s0 + $0xf8] sm:$0xff] }
  0x2a   :  { %316 = vmatmul.f32.gmra.mxu1 %v91_v35  ;;  %589 = vmatpush.msra.mxu2 %v544_v15  ;;  %v512_v35 = vld [vmem:[%s1518_s2 + $0x18] sm:$0xff] }
  0x2b   :  { %701 = vmatpush.msra.mxu3 %v561_v16  ;;  %v134_v16 = vld [vmem:[%s1516_s0 + $0x170] sm:$0xff] }
  0x2c   :  { %590 = vmatpush.msra.mxu2 %v543_v17  ;;  %v135_v17 = vld [vmem:[%s1516_s0 + $0x178] sm:$0xff] }
  0x2d   :  { %702 = vmatpush.msra.mxu3 %v560_v18 }
  0x2e   :  { %591 = vmatpush.msra.mxu2 %v542_v20 }
  0x2f   :  { %703 = vmatpush.msra.mxu3 %v559_v21 }
  0x30   :  { %592 = vmatpush.msra.mxu2 %v541_v23  ;;  %v137_v23 = vld [vmem:[%s1516_s0 + $0x188] sm:$0xff] }
  0x31   :  { %206 = vmatmul.f32.gmra.mxu0 %v92_v36  ;;  %704 = vmatpush.msra.mxu3 %v558_v24 }
  0x32   :  { %319 = vmatmul.f32.gmra.mxu1 %v93_v37 }
  0x33   :  { %705 = vmatpush.msra.mxu3 %v557_v25  ;;  %v521_v25 = vld [vmem:[%s1518_s2 + $0x60] sm:$0xff] }
  0x34   :  { %706 = vmatmul.f32.vlgmr.msra.gmra.mxu3 %v509_v26 }
  0x39   :  { %209 = vmatmul.f32.gmra.mxu0 %v94_v38  ;;  %v120_v38 = vld [vmem:[%s1516_s0 + $0x100] sm:$0xff] }
  0x3a   :  { %322 = vmatmul.f32.gmra.mxu1 %v95_v39  ;;  %v121_v39 = vld [vmem:[%s1516_s0 + $0x108] sm:$0xff] }
  0x3c   :  { %709 = vmatmul.f32.gmra.mxu3 %v510_v29  ;;  %v139_v29 = vld [vmem:[%s1516_s0 + $0x198] sm:$0xff] }
  0x41   :  { %212 = vmatmul.f32.gmra.mxu0 %v96_v40 }
  0x42   :  { %325 = vmatmul.f32.gmra.mxu1 %v97_v41  ;;  %v513_v41 = vld [vmem:[%s1518_s2 + $0x20] sm:$0xff] }
  0x44   :  { %712 = vmatmul.f32.gmra.mxu3 %v511_v32 }
  0x49   :  { %215 = vmatmul.f32.gmra.mxu0 %v98_v42 }
  0x4a   :  { %328 = vmatmul.f32.gmra.mxu1 %v99_v43 }
  0x4c   :  { %715 = vmatmul.f32.gmra.mxu3 %v512_v35  ;;  %v141_v35 = vld [vmem:[%s1516_s0 + $0x1a8] sm:$0xff] }
  0x51   :  { %218 = vmatmul.f32.gmra.mxu0 %v100_v44  ;;  %v122_v44 = vld [vmem:[%s1516_s0 + $0x110] sm:$0xff] }
  0x52   :  { %331 = vmatmul.f32.gmra.mxu1 %v101_v45  ;;  %v123_v45 = vld [vmem:[%s1516_s0 + $0x118] sm:$0xff] }
  0x54   :  { %718 = vmatmul.f32.gmra.mxu3 %v513_v41  ;;  %v143_v41 = vld [vmem:[%s1516_s0 + $0x1b8] sm:$0xff] }
  0x59   :  { %221 = vmatmul.f32.gmra.mxu0 %v102_v46 }
  0x5a   :  { %334 = vmatmul.f32.gmra.mxu1 %v103_v47  ;;  %v514_v47 = vld [vmem:[%s1518_s2 + $0x28] sm:$0xff] }
  0x5c   :  { %721 = vmatmul.f32.gmra.mxu3 %v514_v47  ;;  %v145_v47 = vld [vmem:[%s1516_s0 + $0x1c8] sm:$0xff] }
  0x61   :  { %224 = vmatmul.f32.gmra.mxu0 %v104_v48 }
  0x62   :  { %337 = vmatmul.f32.gmra.mxu1 %v105_v49 }
  0x64   :  { %724 = vmatmul.f32.gmra.mxu3 %v515_v53  ;;  %v147_v53 = vld [vmem:[%s1516_s0 + $0x1d8] sm:$0xff] }
  0x69   :  { %227 = vmatmul.f32.gmra.mxu0 %v106_v57  ;;  %v127_v57 = vld [vmem:[%s1516_s0 + $0x138] sm:$0xff] }
  0x6a   :  { %340 = vmatmul.f32.gmra.mxu1 %v107_v58 }
  0x6c   :  { %727 = vmatmul.f32.gmra.mxu3 %v516_v59  ;;  %v148_v59 = vld [vmem:[%s1516_s0 + $0x1e0] sm:$0xff] }
  0x71   :  { %230 = vmatmul.f32.gmra.mxu0 %v108_v3 }
  0x72   :  { %343 = vmatmul.f32.gmra.mxu1 %v109_v4  ;;  %v130_v4 = vld [vmem:[%s1516_s0 + $0x150] sm:$0xff] }
  0x74   :  { %730 = vmatmul.f32.gmra.mxu3 %v517_v1 }
  0x79   :  { %233 = vmatmul.f32.gmra.mxu0 %v110_v13  ;;  %v519_v13 = vld [vmem:[%s1518_s2 + $0x50] sm:$0xff] }
  0x7a   :  { %346 = vmatmul.f32.gmra.mxu1 %v111_v14 }
  0x7c   :  { %733 = vmatmul.f32.gmra.mxu3 %v518_v7 }
  0x81   :  { %236 = vmatmul.f32.gmra.mxu0 %v112_v19  ;;  %v520_v19 = vld [vmem:[%s1518_s2 + $0x58] sm:$0xff] }
  0x82   :  { %349 = vmatmul.f32.gmra.mxu1 %v113_v22  ;;  %v136_v22 = vld [vmem:[%s1516_s0 + $0x180] sm:$0xff] }
  0x84   :  { %736 = vmatmul.f32.gmra.mxu3 %v519_v13 }
  0x89   :  { %239 = vmatmul.f32.gmra.mxu0 %v114_v27 }
  0x8a   :  { %352 = vmatmul.f32.gmra.mxu1 %v115_v28  ;;  %v138_v28 = vld [vmem:[%s1516_s0 + $0x190] sm:$0xff] }
  0x8c   :  { %739 = vmatmul.f32.gmra.mxu3 %v520_v19 }
  0x91   :  { %242 = vmatmul.f32.gmra.mxu0 %v116_v30 }
  0x92   :  { %355 = vmatmul.f32.gmra.mxu1 %v117_v31  ;;  %v522_v31 = vld [vmem:[%s1518_s2 + $0x68] sm:$0xff] }
  0x94   :  { %742 = vmatmul.f32.gmra.mxu3 %v521_v25 }
  0x99   :  { %245 = vmatmul.f32.gmra.mxu0 %v118_v33 }
  0x9a   :  { %358 = vmatmul.f32.gmra.mxu1 %v119_v34  ;;  %v140_v34 = vld [vmem:[%s1516_s0 + $0x1a0] sm:$0xff] }
  0x9c   :  { %745 = vmatmul.f32.gmra.mxu3 %v522_v31 }
  0x9e   :  { %v201_v36 = vpop.f32.mrf.mxu0 }
  0x9f   :  { %v314_v37 = vpop.f32.mrf.mxu1 }
  0xa0   :  { %v315_v40 = vadd.f32 %v314_v37, %v201_v36  ;;  %v523_v37 = vld [vmem:[%s1518_s2 + $0x70] sm:$0xff] }
  0xa1   :  { %248 = vmatmul.f32.gmra.mxu0 %v120_v38 }
  0xa2   :  { %361 = vmatmul.f32.gmra.mxu1 %v121_v39  ;;  %593 = vmatmul.f32.vlgmr.msra.gmra.mxu2 %v315_v40  ;;  %v142_v40 = vld [vmem:[%s1516_s0 + $0x1b0] sm:$0xff] }
  0xa4   :  { %748 = vmatmul.f32.gmra.mxu3 %v523_v37 }
  0xa6   :  { %v204_v42 = vpop.f32.mrf.mxu0 }
  0xa7   :  { %v317_v43 = vpop.f32.mrf.mxu1 }
  0xa8   :  { %v318_v46 = vadd.f32 %v317_v43, %v204_v42  ;;  %v524_v43 = vld [vmem:[%s1518_s2 + $0x78] sm:$0xff] }
  0xa9   :  { %251 = vmatmul.f32.gmra.mxu0 %v122_v44 }
  0xaa   :  { %364 = vmatmul.f32.gmra.mxu1 %v123_v45  ;;  %596 = vmatmul.f32.gmra.mxu2 %v318_v46  ;;  %v144_v46 = vld [vmem:[%s1516_s0 + $0x1c0] sm:$0xff] }
  0xac   :  { %751 = vmatmul.f32.gmra.mxu3 %v524_v43 }
  0xae   :  { %v207_v48 = vpop.f32.mrf.mxu0 }
  0xaf   :  { %v320_v49 = vpop.f32.mrf.mxu1 }
  0xb0   :  { %v321_v52 = vadd.f32 %v320_v49, %v207_v48  ;;  %v525_v49 = vld [vmem:[%s1518_s2 + $0x80] sm:$0xff] }
  0xb1   :  { %254 = vmatmul.f32.gmra.mxu0 %v124_v50 }
  0xb2   :  { %367 = vmatmul.f32.gmra.mxu1 %v125_v51  ;;  %599 = vmatmul.f32.gmra.mxu2 %v321_v52  ;;  %v146_v52 = vld [vmem:[%s1516_s0 + $0x1d0] sm:$0xff] }
  0xb4   :  { %754 = vmatmul.f32.gmra.mxu3 %v525_v49 }
  0xb6   :  { %v210_v54 = vpop.f32.mrf.mxu0 }
  0xb7   :  { %v323_v55 = vpop.f32.mrf.mxu1 }
  0xb8   :  { %v324_v58 = vadd.f32 %v323_v55, %v210_v54  ;;  %v707_v55 = vpop.f32.mrf.mxu3 }
  0xb9   :  { %257 = vmatmul.f32.gmra.mxu0 %v126_v56  ;;  %v526_v56 = vld [vmem:[%s1518_s2 + $0x88] sm:$0xff] }
  0xba   :  { %370 = vmatmul.f32.gmra.mxu1 %v127_v57  ;;  %602 = vmatmul.f32.gmra.mxu2 %v324_v58 }
  0xbc   :  { %757 = vmatmul.f32.gmra.mxu3 %v526_v56 }
  0xbe   :  { %v213_v60 = vpop.f32.mrf.mxu0 }
  0xbf   :  { %v326_v61 = vpop.f32.mrf.mxu1 }
  0xc0   :  { %v327_v0 = vadd.f32 %v326_v61, %v213_v60  ;;  %v149_v60 = vld [vmem:[%s1516_s0 + $0x1e8] sm:$0xff] }
  0xc1   :  { %260 = vmatmul.f32.gmra.mxu0 %v128_v62  ;;  %v710_v62 = vpop.f32.mrf.mxu3 }
  0xc2   :  { %373 = vmatmul.f32.gmra.mxu1 %v129_v63  ;;  %605 = vmatmul.f32.gmra.mxu2 %v327_v0  ;;  %v527_v63 = vld [vmem:[%s1518_s2 + $0x90] sm:$0xff] }
  0xc4   :  { %760 = vmatmul.f32.gmra.mxu3 %v527_v63 }
  0xc6   :  { %v216_v2 = vpop.f32.mrf.mxu0 }
  0xc7   :  { %v329_v3 = vpop.f32.mrf.mxu1 }
  0xc8   :  { %v330_v6 = vadd.f32 %v329_v3, %v216_v2  ;;  %v150_v2 = vld [vmem:[%s1516_s0 + $0x1f0] sm:$0xff]  ;;  %v151_v3 = vld [vmem:[%s1516_s0 + $0x1f8] sm:$0xff] }
  0xc9   :  { %263 = vmatmul.f32.gmra.mxu0 %v130_v4 }
  0xca   :  { %376 = vmatmul.f32.gmra.mxu1 %v131_v5  ;;  %608 = vmatmul.f32.gmra.mxu2 %v330_v6  ;;  %v713_v5 = vpop.f32.mrf.mxu3  ;;  %v528_v6 = vld [vmem:[%s1518_s2 + $0x98] sm:$0xff] }
  0xcc   :  { %763 = vmatmul.f32.gmra.mxu3 %v528_v6 }
  0xce   :  { %v219_v8 = vpop.f32.mrf.mxu0 }
  0xcf   :  { %v332_v9 = vpop.f32.mrf.mxu1 }
  0xd0   :  { %v333_v12 = vadd.f32 %v332_v9, %v219_v8 }
  0xd1   :  { %266 = vmatmul.f32.gmra.mxu0 %v132_v10 }
  0xd2   :  { %379 = vmatmul.f32.gmra.mxu1 %v133_v11  ;;  %611 = vmatmul.f32.gmra.mxu2 %v333_v12  ;;  %v716_v10 = vpop.f32.mrf.mxu3  ;;  %v1349_v11 = vld [vmem:[%s1519_s4] ss:$0 sm:$0xff] }
  0xd3   :  { %v529_v12 = vld [vmem:[%s1518_s2 + $0xa0] sm:$0xff] }
  0xd4   :  { %766 = vmatmul.f32.gmra.mxu3 %v529_v12  ;;  %v536_v12 = vld [vmem:[%s1518_s2 + $0xd8] sm:$0xff] }
  0xd6   :  { %v222_v14 = vpop.f32.mrf.mxu0 }
  0xd7   :  { %v335_v15 = vpop.f32.mrf.mxu1 }
  0xd8   :  { %v336_v18 = vadd.f32 %v335_v15, %v222_v14 }
  0xd9   :  { %269 = vmatmul.f32.gmra.mxu0 %v134_v16 }
  0xda   :  { %382 = vmatmul.f32.gmra.mxu1 %v135_v17  ;;  %614 = vmatmul.f32.gmra.mxu2 %v336_v18  ;;  %v719_v18 = vpop.f32.mrf.mxu3 }
  0xde   :  { %v225_v20 = vpop.f32.mrf.mxu0 }
  0xdf   :  { %v338_v21 = vpop.f32.mrf.mxu1 }
  0xe0   :  { %v339_v24 = vadd.f32 %v338_v21, %v225_v20  ;;  %v530_v21 = vld [vmem:[%s1518_s2 + $0xa8] sm:$0xff] }
  0xe1   :  { %272 = vmatmul.f32.gmra.mxu0 %v136_v22  ;;  %769 = vmatmul.f32.gmra.mxu3 %v530_v21  ;;  %v537_v21 = vld [vmem:[%s1518_s2 + $0xe0] sm:$0xff] }
  0xe2   :  { %385 = vmatmul.f32.gmra.mxu1 %v137_v23  ;;  %617 = vmatmul.f32.gmra.mxu2 %v339_v24 }
  0xe6   :  { %v228_v26 = vpop.f32.mrf.mxu0 }
  0xe7   :  { %v341_v27 = vpop.f32.mrf.mxu1 }
  0xe8   :  { %v342_v30 = vadd.f32 %v341_v27, %v228_v26  ;;  %v722_v27 = vpop.f32.mrf.mxu3 }
  0xe9   :  { %275 = vmatmul.f32.gmra.mxu0 %v138_v28 }
  0xea   :  { %388 = vmatmul.f32.gmra.mxu1 %v139_v29  ;;  %620 = vmatmul.f32.gmra.mxu2 %v342_v30  ;;  %v531_v30 = vld [vmem:[%s1518_s2 + $0xb0] sm:$0xff] }
  0xeb   :  { %772 = vmatmul.f32.gmra.mxu3 %v531_v30  ;;  %v538_v30 = vld [vmem:[%s1518_s2 + $0xe8] sm:$0xff] }
  0xee   :  { %v231_v32 = vpop.f32.mrf.mxu0 }
  0xef   :  { %v344_v33 = vpop.f32.mrf.mxu1 }
  0xf0   :  { %v345_v36 = vadd.f32 %v344_v33, %v231_v32 }
  0xf1   :  { %278 = vmatmul.f32.gmra.mxu0 %v140_v34 }
  0xf2   :  { %391 = vmatmul.f32.gmra.mxu1 %v141_v35  ;;  %623 = vmatmul.f32.gmra.mxu2 %v345_v36  ;;  %v725_v36 = vpop.f32.mrf.mxu3 }
  0xf6   :  { %v234_v38 = vpop.f32.mrf.mxu0 }
  0xf7   :  { %v347_v39 = vpop.f32.mrf.mxu1 }
  0xf8   :  { %v348_v42 = vadd.f32 %v347_v39, %v234_v38  ;;  %v532_v39 = vld [vmem:[%s1518_s2 + $0xb8] sm:$0xff] }
  0xf9   :  { %281 = vmatmul.f32.gmra.mxu0 %v142_v40  ;;  %775 = vmatmul.f32.gmra.mxu3 %v532_v39  ;;  %v539_v39 = vld [vmem:[%s1518_s2 + $0xf0] sm:$0xff] }
  0xfa   :  { %394 = vmatmul.f32.gmra.mxu1 %v143_v41  ;;  %626 = vmatmul.f32.gmra.mxu2 %v348_v42 }
  0xfe   :  { %v237_v44 = vpop.f32.mrf.mxu0 }
  0xff   :  { %v350_v45 = vpop.f32.mrf.mxu1 }
 0x100   :  { %v351_v48 = vadd.f32 %v350_v45, %v237_v44  ;;  %v728_v45 = vpop.f32.mrf.mxu3 }
 0x101   :  { %284 = vmatmul.f32.gmra.mxu0 %v144_v46 }
 0x102   :  { %397 = vmatmul.f32.gmra.mxu1 %v145_v47  ;;  %629 = vmatmul.f32.gmra.mxu2 %v351_v48  ;;  %v533_v48 = vld [vmem:[%s1518_s2 + $0xc0] sm:$0xff] }
 0x103   :  { %778 = vmatmul.f32.gmra.mxu3 %v533_v48  ;;  %v540_v48 = vld [vmem:[%s1518_s2 + $0xf8] sm:$0xff] }
 0x106   :  { %v240_v50 = vpop.f32.mrf.mxu0 }
 0x107   :  { %v353_v51 = vpop.f32.mrf.mxu1 }
 0x108   :  { %v354_v54 = vadd.f32 %v353_v51, %v240_v50 }
 0x109   :  { %287 = vmatmul.f32.gmra.mxu0 %v146_v52 }
 0x10a   :  { %400 = vmatmul.f32.gmra.mxu1 %v147_v53  ;;  %632 = vmatmul.f32.gmra.mxu2 %v354_v54  ;;  %v731_v54 = vpop.f32.mrf.mxu3 }
 0x10e   :  { %v243_v57 = vpop.f32.mrf.mxu0 }
 0x10f   :  { %v356_v58 = vpop.f32.mrf.mxu1 }
 0x110   :  { %v357_v61 = vadd.f32 %v356_v58, %v243_v57  ;;  %v534_v57 = vld [vmem:[%s1518_s2 + $0xc8] sm:$0xff] }
 0x111   :  { %290 = vmatmul.f32.gmra.mxu0 %v148_v59  ;;  %781 = vmatmul.f32.gmra.mxu3 %v534_v57 }
 0x112   :  { %403 = vmatmul.f32.gmra.mxu1 %v149_v60  ;;  %635 = vmatmul.f32.gmra.mxu2 %v357_v61  ;;  %v734_v63 = vpop.f32.mrf.mxu3 }
 0x116   :  { %v246_v0 = vpop.f32.mrf.mxu0 }
 0x117   :  { %v359_v1 = vpop.f32.mrf.mxu1 }
 0x118   :  { %v360_v4 = vadd.f32 %v359_v1, %v246_v0 }
 0x119   :  { %293 = vmatmul.f32.gmra.mxu0 %v150_v2  ;;  %v535_v2 = vld [vmem:[%s1518_s2 + $0xd0] sm:$0xff] }
 0x11a   :  { %406 = vmatmul.f32.gmra.mxu1 %v151_v3  ;;  %638 = vmatmul.f32.gmra.mxu2 %v360_v4 }
 0x11b   :  { %784 = vmatmul.f32.gmra.mxu3 %v535_v2 }
 0x11e   :  { %v249_v7 = vpop.f32.mrf.mxu0 }
 0x11f   :  { %v362_v8 = vpop.f32.mrf.mxu1 }
 0x120   :  { %v363_v9 = vadd.f32 %v362_v8, %v249_v7  ;;  %v737_v8 = vpop.f32.mrf.mxu3 }
 0x122   :  { %641 = vmatmul.f32.gmra.mxu2 %v363_v9 }
 0x123   :  { %787 = vmatmul.f32.gmra.mxu3 %v536_v12 }
 0x125   :  { %v594_v13 = vpop.f32.mrf.mxu2 }
 0x126   :  { %v595_v14 = vadd.f32 %v1349_v11, %v594_v13  ;;  %v252_v15 = vpop.f32.mrf.mxu0 }
 0x127   :  { %v365_v16 = vpop.f32.mrf.mxu1 }
 0x128   :  { %v366_v17 = vadd.f32 %v365_v16, %v252_v15  ;;  %v708_v19 = vadd.f32 %v707_v55, %v595_v14 }
 0x12a   :  { %v803_v20 = vmax.f32 %v708_v19, 0.0  ;;  %644 = vmatmul.f32.gmra.mxu2 %v366_v17 }
 0x12b   :  { %790 = vmatmul.f32.gmra.mxu3 %v537_v21 }
 0x12c   :  { %835 = vst [vmem:[%s1520_s5] sm:$0xff] %v803_v20 }
 0x12d   :  { %v597_v22 = vpop.f32.mrf.mxu2 }
 0x12e   :  { %v598_v23 = vadd.f32 %v1349_v11, %v597_v22  ;;  %v255_v24 = vpop.f32.mrf.mxu0 }
 0x12f   :  { %v368_v25 = vpop.f32.mrf.mxu1 }
 0x130   :  { %v369_v26 = vadd.f32 %v368_v25, %v255_v24  ;;  %v711_v28 = vadd.f32 %v710_v62, %v598_v23 }
 0x132   :  { %v804_v29 = vmax.f32 %v711_v28, 0.0  ;;  %647 = vmatmul.f32.gmra.mxu2 %v369_v26 }
 0x133   :  { %793 = vmatmul.f32.gmra.mxu3 %v538_v30 }
 0x134   :  { %836 = vst [vmem:[%s1520_s5 + $0x8] sm:$0xff] %v804_v29 }
 0x135   :  { %v600_v31 = vpop.f32.mrf.mxu2 }
 0x136   :  { %v601_v32 = vadd.f32 %v1349_v11, %v600_v31  ;;  %v258_v33 = vpop.f32.mrf.mxu0 }
 0x137   :  { %v371_v34 = vpop.f32.mrf.mxu1 }
 0x138   :  { %v372_v35 = vadd.f32 %v371_v34, %v258_v33  ;;  %v714_v37 = vadd.f32 %v713_v5, %v601_v32 }
 0x13a   :  { %v805_v38 = vmax.f32 %v714_v37, 0.0  ;;  %650 = vmatmul.f32.gmra.mxu2 %v372_v35 }
 0x13b   :  { %796 = vmatmul.f32.gmra.mxu3 %v539_v39 }
 0x13c   :  { %837 = vst [vmem:[%s1520_s5 + $0x10] sm:$0xff] %v805_v38 }
 0x13d   :  { %v603_v40 = vpop.f32.mrf.mxu2 }
 0x13e   :  { %v604_v41 = vadd.f32 %v1349_v11, %v603_v40  ;;  %v261_v42 = vpop.f32.mrf.mxu0 }
 0x13f   :  { %v374_v43 = vpop.f32.mrf.mxu1 }
 0x140   :  { %v375_v44 = vadd.f32 %v374_v43, %v261_v42  ;;  %v717_v46 = vadd.f32 %v716_v10, %v604_v41 }
 0x142   :  { %v806_v47 = vmax.f32 %v717_v46, 0.0  ;;  %653 = vmatmul.f32.gmra.mxu2 %v375_v44 }
 0x143   :  { %799 = vmatmul.f32.gmra.mxu3 %v540_v48 }
 0x144   :  { %838 = vst [vmem:[%s1520_s5 + $0x18] sm:$0xff] %v806_v47 }
 0x145   :  { %v606_v49 = vpop.f32.mrf.mxu2 }
 0x146   :  { %v607_v50 = vadd.f32 %v1349_v11, %v606_v49  ;;  %v264_v51 = vpop.f32.mrf.mxu0 }
 0x147   :  { %v377_v52 = vpop.f32.mrf.mxu1 }
 0x148   :  { %v378_v53 = vadd.f32 %v377_v52, %v264_v51  ;;  %v720_v55 = vadd.f32 %v719_v18, %v607_v50  ;;  %v740_v18 = vpop.f32.mrf.mxu3 }
 0x14a   :  { %v807_v56 = vmax.f32 %v720_v55, 0.0  ;;  %656 = vmatmul.f32.gmra.mxu2 %v378_v53 }
 0x14c   :  { %839 = vst [vmem:[%s1520_s5 + $0x20] sm:$0xff] %v807_v56 }
 0x14d   :  { %v609_v58 = vpop.f32.mrf.mxu2 }
 0x14e   :  { %v610_v59 = vadd.f32 %v1349_v11, %v609_v58  ;;  %v267_v60 = vpop.f32.mrf.mxu0 }
 0x14f   :  { %v380_v61 = vpop.f32.mrf.mxu1 }
 0x150   :  { %v381_v62 = vadd.f32 %v380_v61, %v267_v60  ;;  %v723_v0 = vadd.f32 %v722_v27, %v610_v59  ;;  %v743_v27 = vpop.f32.mrf.mxu3 }
 0x152   :  { %v808_v1 = vmax.f32 %v723_v0, 0.0  ;;  %659 = vmatmul.f32.gmra.mxu2 %v381_v62 }
 0x154   :  { %840 = vst [vmem:[%s1520_s5 + $0x28] sm:$0xff] %v808_v1 }
 0x155   :  { %v612_v3 = vpop.f32.mrf.mxu2 }
 0x156   :  { %v613_v4 = vadd.f32 %v1349_v11, %v612_v3  ;;  %v270_v5 = vpop.f32.mrf.mxu0 }
 0x157   :  { %v383_v6 = vpop.f32.mrf.mxu1 }
 0x158   :  { %v384_v7 = vadd.f32 %v383_v6, %v270_v5  ;;  %v726_v9 = vadd.f32 %v725_v36, %v613_v4  ;;  %v746_v36 = vpop.f32.mrf.mxu3 }
 0x15a   :  { %v809_v10 = vmax.f32 %v726_v9, 0.0  ;;  %662 = vmatmul.f32.gmra.mxu2 %v384_v7 }
 0x15c   :  { %841 = vst [vmem:[%s1520_s5 + $0x30] sm:$0xff] %v809_v10 }
 0x15d   :  { %v615_v13 = vpop.f32.mrf.mxu2 }
 0x15e   :  { %v616_v14 = vadd.f32 %v1349_v11, %v615_v13  ;;  %v273_v15 = vpop.f32.mrf.mxu0 }
 0x15f   :  { %v386_v16 = vpop.f32.mrf.mxu1 }
 0x160   :  { %v387_v17 = vadd.f32 %v386_v16, %v273_v15  ;;  %v729_v19 = vadd.f32 %v728_v45, %v616_v14  ;;  %v749_v45 = vpop.f32.mrf.mxu3 }
 0x162   :  { %v810_v20 = vmax.f32 %v729_v19, 0.0  ;;  %665 = vmatmul.f32.gmra.mxu2 %v387_v17 }
 0x164   :  { %842 = vst [vmem:[%s1520_s5 + $0x38] sm:$0xff] %v810_v20 }
 0x165   :  { %v618_v22 = vpop.f32.mrf.mxu2 }
 0x166   :  { %v619_v23 = vadd.f32 %v1349_v11, %v618_v22  ;;  %v276_v24 = vpop.f32.mrf.mxu0 }
 0x167   :  { %v389_v25 = vpop.f32.mrf.mxu1 }
 0x168   :  { %v390_v26 = vadd.f32 %v389_v25, %v276_v24  ;;  %v732_v28 = vadd.f32 %v731_v54, %v619_v23  ;;  %v752_v54 = vpop.f32.mrf.mxu3 }
 0x16a   :  { %v811_v29 = vmax.f32 %v732_v28, 0.0  ;;  %668 = vmatmul.f32.gmra.mxu2 %v390_v26 }
 0x16c   :  { %843 = vst [vmem:[%s1520_s5 + $0x40] sm:$0xff] %v811_v29 }
 0x16d   :  { %v621_v31 = vpop.f32.mrf.mxu2 }
 0x16e   :  { %v622_v32 = vadd.f32 %v1349_v11, %v621_v31  ;;  %v279_v33 = vpop.f32.mrf.mxu0 }
 0x16f   :  { %v392_v34 = vpop.f32.mrf.mxu1 }
 0x170   :  { %v393_v35 = vadd.f32 %v392_v34, %v279_v33  ;;  %v735_v37 = vadd.f32 %v734_v63, %v622_v32  ;;  %v755_v62 = vpop.f32.mrf.mxu3 }
 0x172   :  { %v812_v38 = vmax.f32 %v735_v37, 0.0  ;;  %671 = vmatmul.f32.gmra.mxu2 %v393_v35 }
 0x174   :  { %844 = vst [vmem:[%s1520_s5 + $0x48] sm:$0xff] %v812_v38 }
 0x175   :  { %v624_v40 = vpop.f32.mrf.mxu2 }
 0x176   :  { %v625_v41 = vadd.f32 %v1349_v11, %v624_v40  ;;  %v282_v42 = vpop.f32.mrf.mxu0 }
 0x177   :  { %v395_v43 = vpop.f32.mrf.mxu1 }
 0x178   :  { %v396_v44 = vadd.f32 %v395_v43, %v282_v42  ;;  %v738_v46 = vadd.f32 %v737_v8, %v625_v41  ;;  %v758_v7 = vpop.f32.mrf.mxu3 }
 0x17a   :  { %v813_v47 = vmax.f32 %v738_v46, 0.0  ;;  %674 = vmatmul.f32.gmra.mxu2 %v396_v44 }
 0x17c   :  { %845 = vst [vmem:[%s1520_s5 + $0x50] sm:$0xff] %v813_v47 }
 0x17d   :  { %v627_v49 = vpop.f32.mrf.mxu2 }
 0x17e   :  { %v628_v50 = vadd.f32 %v1349_v11, %v627_v49  ;;  %v285_v51 = vpop.f32.mrf.mxu0 }
 0x17f   :  { %v398_v52 = vpop.f32.mrf.mxu1 }
 0x180   :  { %v399_v53 = vadd.f32 %v398_v52, %v285_v51  ;;  %v741_v55 = vadd.f32 %v740_v18, %v628_v50  ;;  %v761_v17 = vpop.f32.mrf.mxu3 }
 0x182   :  { %v814_v56 = vmax.f32 %v741_v55, 0.0  ;;  %677 = vmatmul.f32.gmra.mxu2 %v399_v53 }
 0x184   :  { %846 = vst [vmem:[%s1520_s5 + $0x58] sm:$0xff] %v814_v56 }
 0x185   :  { %v630_v57 = vpop.f32.mrf.mxu2 }
 0x186   :  { %v631_v58 = vadd.f32 %v1349_v11, %v630_v57  ;;  %v288_v59 = vpop.f32.mrf.mxu0 }
 0x187   :  { %v401_v60 = vpop.f32.mrf.mxu1 }
 0x188   :  { %v402_v61 = vadd.f32 %v401_v60, %v288_v59  ;;  %v744_v63 = vadd.f32 %v743_v27, %v631_v58  ;;  %v764_v23 = vpop.f32.mrf.mxu3 }
 0x18a   :  { %v815_v0 = vmax.f32 %v744_v63, 0.0  ;;  %680 = vmatmul.f32.gmra.mxu2 %v402_v61 }
 0x18c   :  { %847 = vst [vmem:[%s1520_s5 + $0x60] sm:$0xff] %v815_v0 }
 0x18d   :  { %v633_v1 = vpop.f32.mrf.mxu2 }
 0x18e   :  { %v634_v2 = vadd.f32 %v1349_v11, %v633_v1  ;;  %v291_v3 = vpop.f32.mrf.mxu0 }
 0x18f   :  { %v404_v4 = vpop.f32.mrf.mxu1 }
 0x190   :  { %v405_v5 = vadd.f32 %v404_v4, %v291_v3  ;;  %v747_v6 = vadd.f32 %v746_v36, %v634_v2  ;;  %v767_v29 = vpop.f32.mrf.mxu3 }
 0x192   :  { %v816_v8 = vmax.f32 %v747_v6, 0.0  ;;  %683 = vmatmul.f32.gmra.mxu2 %v405_v5 }
 0x194   :  { %848 = vst [vmem:[%s1520_s5 + $0x68] sm:$0xff] %v816_v8 }
 0x195   :  { %v636_v9 = vpop.f32.mrf.mxu2 }
 0x196   :  { %v637_v10 = vadd.f32 %v1349_v11, %v636_v9  ;;  %v294_v12 = vpop.f32.mrf.mxu0 }
 0x197   :  { %v407_v13 = vpop.f32.mrf.mxu1 }
 0x198   :  { %v408_v14 = vadd.f32 %v407_v13, %v294_v12  ;;  %v750_v15 = vadd.f32 %v749_v45, %v637_v10  ;;  %v770_v35 = vpop.f32.mrf.mxu3 }
 0x19a   :  { %v817_v16 = vmax.f32 %v750_v15, 0.0  ;;  %686 = vmatmul.f32.gmra.mxu2 %v408_v14 }
 0x19c   :  { %849 = vst [vmem:[%s1520_s5 + $0x70] sm:$0xff] %v817_v16 }
 0x19d   :  { %v639_v18 = vpop.f32.mrf.mxu2 }
 0x19e   :  { %v640_v19 = vadd.f32 %v1349_v11, %v639_v18 }
 0x1a0   :  { %v753_v20 = vadd.f32 %v752_v54, %v640_v19  ;;  %v773_v41 = vpop.f32.mrf.mxu3 }
 0x1a2   :  { %v818_v21 = vmax.f32 %v753_v20, 0.0 }
 0x1a4   :  { %850 = vst [vmem:[%s1520_s5 + $0x78] sm:$0xff] %v818_v21 }
 0x1a5   :  { %v642_v22 = vpop.f32.mrf.mxu2 }
 0x1a6   :  { %v643_v24 = vadd.f32 %v1349_v11, %v642_v22 }
 0x1a8   :  { %v756_v25 = vadd.f32 %v755_v62, %v643_v24  ;;  %v776_v47 = vpop.f32.mrf.mxu3 }
 0x1aa   :  { %v819_v26 = vmax.f32 %v756_v25, 0.0 }
 0x1ac   :  { %851 = vst [vmem:[%s1520_s5 + $0x80] sm:$0xff] %v819_v26 }
 0x1ad   :  { %v645_v27 = vpop.f32.mrf.mxu2 }
 0x1ae   :  { %v646_v28 = vadd.f32 %v1349_v11, %v645_v27 }
 0x1b0   :  { %v759_v30 = vadd.f32 %v758_v7, %v646_v28  ;;  %v779_v53 = vpop.f32.mrf.mxu3 }
 0x1b2   :  { %v820_v31 = vmax.f32 %v759_v30, 0.0 }
 0x1b4   :  { %852 = vst [vmem:[%s1520_s5 + $0x88] sm:$0xff] %v820_v31 }
 0x1b5   :  { %v648_v32 = vpop.f32.mrf.mxu2 }
 0x1b6   :  { %v649_v33 = vadd.f32 %v1349_v11, %v648_v32 }
 0x1b8   :  { %v762_v34 = vadd.f32 %v761_v17, %v649_v33  ;;  %v782_v59 = vpop.f32.mrf.mxu3 }
 0x1ba   :  { %v821_v36 = vmax.f32 %v762_v34, 0.0 }
 0x1bc   :  { %853 = vst [vmem:[%s1520_s5 + $0x90] sm:$0xff] %v821_v36 }
 0x1bd   :  { %v651_v37 = vpop.f32.mrf.mxu2 }
 0x1be   :  { %v652_v38 = vadd.f32 %v1349_v11, %v651_v37 }
 0x1c0   :  { %v765_v39 = vadd.f32 %v764_v23, %v652_v38  ;;  %v785_v1 = vpop.f32.mrf.mxu3 }
 0x1c2   :  { %v822_v40 = vmax.f32 %v765_v39, 0.0 }
 0x1c4   :  { %854 = vst [vmem:[%s1520_s5 + $0x98] sm:$0xff] %v822_v40 }
 0x1c5   :  { %v654_v42 = vpop.f32.mrf.mxu2 }
 0x1c6   :  { %v655_v43 = vadd.f32 %v1349_v11, %v654_v42 }
 0x1c8   :  { %v768_v44 = vadd.f32 %v767_v29, %v655_v43  ;;  %v788_v7 = vpop.f32.mrf.mxu3 }
 0x1ca   :  { %v823_v45 = vmax.f32 %v768_v44, 0.0 }
 0x1cc   :  { %855 = vst [vmem:[%s1520_s5 + $0xa0] sm:$0xff] %v823_v45 }
 0x1cd   :  { %v657_v46 = vpop.f32.mrf.mxu2 }
 0x1ce   :  { %v658_v48 = vadd.f32 %v1349_v11, %v657_v46 }
 0x1d0   :  { %v771_v49 = vadd.f32 %v770_v35, %v658_v48  ;;  %v791_v14 = vpop.f32.mrf.mxu3 }
 0x1d2   :  { %v824_v50 = vmax.f32 %v771_v49, 0.0 }
 0x1d4   :  { %856 = vst [vmem:[%s1520_s5 + $0xa8] sm:$0xff] %v824_v50 }
 0x1d5   :  { %v660_v51 = vpop.f32.mrf.mxu2 }
 0x1d6   :  { %v661_v52 = vadd.f32 %v1349_v11, %v660_v51 }
 0x1d8   :  { %v774_v54 = vadd.f32 %v773_v41, %v661_v52  ;;  %v794_v20 = vpop.f32.mrf.mxu3 }
 0x1da   :  { %v825_v55 = vmax.f32 %v774_v54, 0.0 }
 0x1dc   :  { %857 = vst [vmem:[%s1520_s5 + $0xb0] sm:$0xff] %v825_v55 }
 0x1dd   :  { %v663_v56 = vpop.f32.mrf.mxu2 }
 0x1de   :  { %v664_v57 = vadd.f32 %v1349_v11, %v663_v56 }
 0x1e0   :  { %v777_v58 = vadd.f32 %v776_v47, %v664_v57  ;;  %v797_v26 = vpop.f32.mrf.mxu3 }
 0x1e2   :  { %v826_v60 = vmax.f32 %v777_v58, 0.0 }
 0x1e4   :  { %858 = vst [vmem:[%s1520_s5 + $0xb8] sm:$0xff] %v826_v60 }
 0x1e5   :  { %v666_v61 = vpop.f32.mrf.mxu2 }
 0x1e6   :  { %v667_v62 = vadd.f32 %v1349_v11, %v666_v61 }
 0x1e8   :  { %v780_v63 = vadd.f32 %v779_v53, %v667_v62  ;;  %v800_v32 = vpop.f32.mrf.mxu3 }
 0x1ea   :  { %v827_v0 = vmax.f32 %v780_v63, 0.0 }
 0x1ec   :  { %859 = vst [vmem:[%s1520_s5 + $0xc0] sm:$0xff] %v827_v0 }
 0x1ed   :  { %v669_v2 = vpop.f32.mrf.mxu2 }
 0x1ee   :  { %v670_v3 = vadd.f32 %v1349_v11, %v669_v2 }
 0x1f0   :  { %v783_v4 = vadd.f32 %v782_v59, %v670_v3 }
 0x1f2   :  { %v828_v5 = vmax.f32 %v783_v4, 0.0 }
 0x1f4   :  { %860 = vst [vmem:[%s1520_s5 + $0xc8] sm:$0xff] %v828_v5 }
 0x1f5   :  { %v672_v6 = vpop.f32.mrf.mxu2 }
 0x1f6   :  { %v673_v8 = vadd.f32 %v1349_v11, %v672_v6 }
 0x1f8   :  { %v786_v9 = vadd.f32 %v785_v1, %v673_v8 }
 0x1fa   :  { %v829_v10 = vmax.f32 %v786_v9, 0.0 }
 0x1fc   :  { %861 = vst [vmem:[%s1520_s5 + $0xd0] sm:$0xff] %v829_v10 }
 0x1fd   :  { %v675_v12 = vpop.f32.mrf.mxu2 }
 0x1fe   :  { %v676_v13 = vadd.f32 %v1349_v11, %v675_v12 }
 0x200   :  { %v789_v15 = vadd.f32 %v788_v7, %v676_v13 }
 0x202   :  { %v830_v16 = vmax.f32 %v789_v15, 0.0 }
 0x204   :  { %862 = vst [vmem:[%s1520_s5 + $0xd8] sm:$0xff] %v830_v16 }
 0x205   :  { %v678_v17 = vpop.f32.mrf.mxu2 }
 0x206   :  { %v679_v18 = vadd.f32 %v1349_v11, %v678_v17 }
 0x208   :  { %v792_v19 = vadd.f32 %v791_v14, %v679_v18 }
 0x20a   :  { %v831_v21 = vmax.f32 %v792_v19, 0.0 }
 0x20c   :  { %863 = vst [vmem:[%s1520_s5 + $0xe0] sm:$0xff] %v831_v21 }
 0x20d   :  { %v681_v22 = vpop.f32.mrf.mxu2 }
 0x20e   :  { %v682_v23 = vadd.f32 %v1349_v11, %v681_v22 }
 0x210   :  { %v795_v24 = vadd.f32 %v794_v20, %v682_v23 }
 0x212   :  { %v832_v25 = vmax.f32 %v795_v24, 0.0 }
 0x214   :  { %864 = vst [vmem:[%s1520_s5 + $0xe8] sm:$0xff] %v832_v25 }
 0x215   :  { %v684_v27 = vpop.f32.mrf.mxu2 }
 0x216   :  { %v685_v28 = vadd.f32 %v1349_v11, %v684_v27 }
 0x218   :  { %v798_v29 = vadd.f32 %v797_v26, %v685_v28 }
 0x21a   :  { %v833_v30 = vmax.f32 %v798_v29, 0.0 }
 0x21c   :  { %865 = vst [vmem:[%s1520_s5 + $0xf0] sm:$0xff] %v833_v30 }
 0x21d   :  { %v687_v31 = vpop.f32.mrf.mxu2 }
 0x21e   :  { %v688_v33 = vadd.f32 %v1349_v11, %v687_v31 }
 0x220   :  { %v801_v34 = vadd.f32 %v800_v32, %v688_v33 }
 0x222   :  { %v834_v35 = vmax.f32 %v801_v34, 0.0 }
 0x224   :  { %866 = vst [vmem:[%s1520_s5 + $0xf8] sm:$0xff] %v834_v35 }

// kernel: sage_model_forward.3
= control target key start
LH: loop header
LB: loop body
LE: loop exit
PB: predicated region body
PF: predicated region fallthrough
CT: control target
= control target key end

     0   :  { %s1579_s3 = inlined_call_operand.vmem [shape: f32[128,128], index: 3, kind: input, shape index: {}]   ;;  %s1580_s1 = inlined_call_operand.vmem [shape: f32[256,128], index: 1, kind: input, shape index: {}, may-alias: {1,2}]   ;;  %s1581_s4 = inlined_call_operand.vmem [shape: f32[128,128], index: 4, kind: input, shape index: {}]   ;;  %s1582_s2 = inlined_call_operand.vmem [shape: f32[256,128], index: 2, kind: input, shape index: {}, may-alias: {1,2}]   ;;  %s1583_s0 = inlined_call_operand.vmem [shape: f32[256,256], index: 0, kind: input, shape index: {}]   ;;  %s1584_s5 = inlined_call_operand.vmem [shape: f32[1,128], index: 5, kind: input, shape index: {}]   ;;  %s1585_s6 = inlined_call_operand.vmem [shape: f32[256,128], index: 6, kind: output, shape index: {}]  }
   0x1   :  { %v106_v0 = vld [vmem:[%s1579_s3 + $0x78] sm:$0xff]  ;;  %v105_v1 = vld [vmem:[%s1579_s3 + $0x70] sm:$0xff]  ;;  %v104_v2 = vld [vmem:[%s1579_s3 + $0x68] sm:$0xff] }
   0x2   :  { %107 = vmatpush.msra.mxu0 %v106_v0  ;;  %v103_v3 = vld [vmem:[%s1579_s3 + $0x60] sm:$0xff]  ;;  %v102_v4 = vld [vmem:[%s1579_s3 + $0x58] sm:$0xff]  ;;  %v101_v5 = vld [vmem:[%s1579_s3 + $0x50] sm:$0xff] }
   0x3   :  { %v100_v6 = vld [vmem:[%s1579_s3 + $0x48] sm:$0xff]  ;;  %v99_v7 = vld [vmem:[%s1579_s3 + $0x40] sm:$0xff]  ;;  %v98_v8 = vld [vmem:[%s1579_s3 + $0x38] sm:$0xff] }
   0x4   :  { %108 = vmatpush.msra.mxu0 %v105_v1  ;;  %v97_v9 = vld [vmem:[%s1579_s3 + $0x30] sm:$0xff]  ;;  %v96_v10 = vld [vmem:[%s1579_s3 + $0x28] sm:$0xff]  ;;  %v95_v11 = vld [vmem:[%s1579_s3 + $0x20] sm:$0xff] }
   0x5   :  { %v94_v12 = vld [vmem:[%s1579_s3 + $0x18] sm:$0xff]  ;;  %v93_v13 = vld [vmem:[%s1579_s3 + $0x10] sm:$0xff]  ;;  %v92_v14 = vld [vmem:[%s1579_s3 + $0x8] sm:$0xff] }
   0x6   :  { %109 = vmatpush.msra.mxu0 %v104_v2  ;;  %v91_v15 = vld [vmem:[%s1579_s3] sm:$0xff]  ;;  %v60_v17 = vld [vmem:[%s1580_s1 + $0x8] sm:$0xff]  ;;  %v61_v18 = vld [vmem:[%s1580_s1 + $0x10] sm:$0xff] }
   0x7   :  { %v59_v16 = vld [vmem:[%s1580_s1] sm:$0xff]  ;;  %v62_v19 = vld [vmem:[%s1580_s1 + $0x18] sm:$0xff]  ;;  %v64_v21 = vld [vmem:[%s1580_s1 + $0x28] sm:$0xff] }
   0x8   :  { %110 = vmatpush.msra.mxu0 %v103_v3  ;;  %v63_v20 = vld [vmem:[%s1580_s1 + $0x20] sm:$0xff]  ;;  %v65_v22 = vld [vmem:[%s1580_s1 + $0x30] sm:$0xff]  ;;  %v66_v23 = vld [vmem:[%s1580_s1 + $0x38] sm:$0xff] }
   0x9   :  { %v67_v24 = vld [vmem:[%s1580_s1 + $0x40] sm:$0xff]  ;;  %v68_v25 = vld [vmem:[%s1580_s1 + $0x48] sm:$0xff]  ;;  %v69_v26 = vld [vmem:[%s1580_s1 + $0x50] sm:$0xff] }
   0xa   :  { %111 = vmatpush.msra.mxu0 %v102_v4  ;;  %v70_v27 = vld [vmem:[%s1580_s1 + $0x58] sm:$0xff]  ;;  %v71_v28 = vld [vmem:[%s1580_s1 + $0x60] sm:$0xff]  ;;  %v72_v29 = vld [vmem:[%s1580_s1 + $0x68] sm:$0xff] }
   0xb   :  { %v73_v30 = vld [vmem:[%s1580_s1 + $0x70] sm:$0xff]  ;;  %v74_v31 = vld [vmem:[%s1580_s1 + $0x78] sm:$0xff]  ;;  %v75_v33 = vld [vmem:[%s1580_s1 + $0x80] sm:$0xff] }
   0xc   :  { %112 = vmatpush.msra.mxu0 %v101_v5  ;;  %v76_v35 = vld [vmem:[%s1580_s1 + $0x88] sm:$0xff]  ;;  %v77_v37 = vld [vmem:[%s1580_s1 + $0x90] sm:$0xff]  ;;  %v78_v39 = vld [vmem:[%s1580_s1 + $0x98] sm:$0xff] }
   0xd   :  { %v79_v41 = vld [vmem:[%s1580_s1 + $0xa0] sm:$0xff]  ;;  %v80_v43 = vld [vmem:[%s1580_s1 + $0xa8] sm:$0xff]  ;;  %v81_v45 = vld [vmem:[%s1580_s1 + $0xb0] sm:$0xff] }
   0xe   :  { %113 = vmatpush.msra.mxu0 %v100_v6  ;;  %v82_v47 = vld [vmem:[%s1580_s1 + $0xb8] sm:$0xff]  ;;  %v83_v49 = vld [vmem:[%s1580_s1 + $0xc0] sm:$0xff]  ;;  %v84_v51 = vld [vmem:[%s1580_s1 + $0xc8] sm:$0xff] }
   0xf   :  { %v85_v53 = vld [vmem:[%s1580_s1 + $0xd0] sm:$0xff]  ;;  %v86_v55 = vld [vmem:[%s1580_s1 + $0xd8] sm:$0xff]  ;;  %v87_v57 = vld [vmem:[%s1580_s1 + $0xe0] sm:$0xff] }
  0x10   :  { %114 = vmatpush.msra.mxu0 %v99_v7  ;;  %v88_v59 = vld [vmem:[%s1580_s1 + $0xe8] sm:$0xff]  ;;  %v89_v61 = vld [vmem:[%s1580_s1 + $0xf0] sm:$0xff]  ;;  %v90_v63 = vld [vmem:[%s1580_s1 + $0xf8] sm:$0xff] }
  0x12   :  { %115 = vmatpush.msra.mxu0 %v98_v8 }
  0x14   :  { %116 = vmatpush.msra.mxu0 %v97_v9 }
  0x16   :  { %117 = vmatpush.msra.mxu0 %v96_v10 }
  0x18   :  { %118 = vmatpush.msra.mxu0 %v95_v11 }
  0x1a   :  { %119 = vmatpush.msra.mxu0 %v94_v12  ;;  %v688_v12 = vld [vmem:[%s1581_s4 + $0x78] sm:$0xff] }
  0x1b   :  { %689 = vmatpush.msra.mxu3 %v688_v12  ;;  %v277_v12 = vld [vmem:[%s1583_s0 + $0xc8] sm:$0xff] }
  0x1c   :  { %120 = vmatpush.msra.mxu0 %v93_v13  ;;  %v687_v13 = vld [vmem:[%s1581_s4 + $0x70] sm:$0xff] }
  0x1d   :  { %690 = vmatpush.msra.mxu3 %v687_v13  ;;  %v657_v13 = vld [vmem:[%s1582_s2 + $0x80] sm:$0xff] }
  0x1e   :  { %121 = vmatpush.msra.mxu0 %v92_v14  ;;  %v686_v14 = vld [vmem:[%s1581_s4 + $0x68] sm:$0xff] }
  0x1f   :  { %691 = vmatpush.msra.mxu3 %v686_v14 }
  0x20   :  { %122 = vmatpush.msra.mxu0 %v91_v15 }
  0x21   :  { %123 = vmatmul.f32.vlgmr.msra.gmra.mxu0 %v59_v16  ;;  %v685_v16 = vld [vmem:[%s1581_s4 + $0x60] sm:$0xff] }
  0x22   :  { %692 = vmatpush.msra.mxu3 %v685_v16 }
  0x29   :  { %126 = vmatmul.f32.gmra.mxu0 %v60_v17  ;;  %v684_v17 = vld [vmem:[%s1581_s4 + $0x58] sm:$0xff] }
  0x2a   :  { %693 = vmatpush.msra.mxu3 %v684_v17  ;;  %v284_v17 = vld [vmem:[%s1583_s0 + $0x100] sm:$0xff] }
  0x31   :  { %129 = vmatmul.f32.gmra.mxu0 %v61_v18  ;;  %v683_v18 = vld [vmem:[%s1581_s4 + $0x50] sm:$0xff] }
  0x32   :  { %694 = vmatpush.msra.mxu3 %v683_v18  ;;  %v658_v18 = vld [vmem:[%s1582_s2 + $0x88] sm:$0xff] }
  0x39   :  { %132 = vmatmul.f32.gmra.mxu0 %v62_v19  ;;  %v682_v19 = vld [vmem:[%s1581_s4 + $0x48] sm:$0xff] }
  0x3a   :  { %695 = vmatpush.msra.mxu3 %v682_v19 }
  0x41   :  { %135 = vmatmul.f32.gmra.mxu0 %v63_v20 }
  0x49   :  { %138 = vmatmul.f32.gmra.mxu0 %v64_v21  ;;  %v681_v21 = vld [vmem:[%s1581_s4 + $0x40] sm:$0xff] }
  0x4a   :  { %696 = vmatpush.msra.mxu3 %v681_v21 }
  0x51   :  { %141 = vmatmul.f32.gmra.mxu0 %v65_v22  ;;  %v680_v22 = vld [vmem:[%s1581_s4 + $0x38] sm:$0xff] }
  0x52   :  { %697 = vmatpush.msra.mxu3 %v680_v22  ;;  %v286_v22 = vld [vmem:[%s1583_s0 + $0x110] sm:$0xff] }
  0x59   :  { %144 = vmatmul.f32.gmra.mxu0 %v66_v23  ;;  %v679_v23 = vld [vmem:[%s1581_s4 + $0x30] sm:$0xff] }
  0x5a   :  { %698 = vmatpush.msra.mxu3 %v679_v23  ;;  %v659_v23 = vld [vmem:[%s1582_s2 + $0x90] sm:$0xff] }
  0x61   :  { %147 = vmatmul.f32.gmra.mxu0 %v67_v24  ;;  %v678_v24 = vld [vmem:[%s1581_s4 + $0x28] sm:$0xff] }
  0x62   :  { %699 = vmatpush.msra.mxu3 %v678_v24 }
  0x69   :  { %150 = vmatmul.f32.gmra.mxu0 %v68_v25 }
  0x71   :  { %153 = vmatmul.f32.gmra.mxu0 %v69_v26  ;;  %v677_v26 = vld [vmem:[%s1581_s4 + $0x20] sm:$0xff] }
  0x72   :  { %700 = vmatpush.msra.mxu3 %v677_v26 }
  0x79   :  { %156 = vmatmul.f32.gmra.mxu0 %v70_v27  ;;  %v676_v27 = vld [vmem:[%s1581_s4 + $0x18] sm:$0xff] }
  0x7a   :  { %701 = vmatpush.msra.mxu3 %v676_v27  ;;  %v288_v27 = vld [vmem:[%s1583_s0 + $0x120] sm:$0xff] }
  0x81   :  { %159 = vmatmul.f32.gmra.mxu0 %v71_v28  ;;  %v675_v28 = vld [vmem:[%s1581_s4 + $0x10] sm:$0xff] }
  0x82   :  { %702 = vmatpush.msra.mxu3 %v675_v28  ;;  %v660_v28 = vld [vmem:[%s1582_s2 + $0x98] sm:$0xff] }
  0x89   :  { %162 = vmatmul.f32.gmra.mxu0 %v72_v29  ;;  %v674_v29 = vld [vmem:[%s1581_s4 + $0x8] sm:$0xff] }
  0x8a   :  { %703 = vmatpush.msra.mxu3 %v674_v29 }
  0x91   :  { %165 = vmatmul.f32.gmra.mxu0 %v73_v30 }
  0x99   :  { %168 = vmatmul.f32.gmra.mxu0 %v74_v31  ;;  %v673_v31 = vld [vmem:[%s1581_s4] sm:$0xff] }
  0x9a   :  { %704 = vmatpush.msra.mxu3 %v673_v31 }
  0x9e   :  { %v1038_v32 = vpop.f32.mrf.mxu0 }
  0xa1   :  { %171 = vmatmul.f32.gmra.mxu0 %v75_v33  ;;  %v252_v33 = vld [vmem:[%s1583_s0] sm:$0xff] }
  0xa6   :  { %v127_v34 = vpop.f32.mrf.mxu0 }
  0xa9   :  { %174 = vmatmul.f32.gmra.mxu0 %v76_v35  ;;  %v254_v35 = vld [vmem:[%s1583_s0 + $0x10] sm:$0xff] }
  0xae   :  { %v130_v36 = vpop.f32.mrf.mxu0 }
  0xb1   :  { %177 = vmatmul.f32.gmra.mxu0 %v77_v37  ;;  %v256_v37 = vld [vmem:[%s1583_s0 + $0x20] sm:$0xff] }
  0xb6   :  { %v133_v38 = vpop.f32.mrf.mxu0 }
  0xb9   :  { %180 = vmatmul.f32.gmra.mxu0 %v78_v39  ;;  %v258_v39 = vld [vmem:[%s1583_s0 + $0x30] sm:$0xff] }
  0xbe   :  { %v136_v40 = vpop.f32.mrf.mxu0 }
  0xc1   :  { %183 = vmatmul.f32.gmra.mxu0 %v79_v41  ;;  %v645_v41 = vld [vmem:[%s1582_s2 + $0x20] sm:$0xff] }
  0xc6   :  { %v139_v42 = vpop.f32.mrf.mxu0 }
  0xc9   :  { %186 = vmatmul.f32.gmra.mxu0 %v80_v43  ;;  %v255_v43 = vld [vmem:[%s1583_s0 + $0x18] sm:$0xff] }
  0xce   :  { %v142_v44 = vpop.f32.mrf.mxu0 }
  0xd1   :  { %189 = vmatmul.f32.gmra.mxu0 %v81_v45  ;;  %v262_v45 = vld [vmem:[%s1583_s0 + $0x50] sm:$0xff] }
  0xd6   :  { %v145_v46 = vpop.f32.mrf.mxu0 }
  0xd9   :  { %192 = vmatmul.f32.gmra.mxu0 %v82_v47  ;;  %v647_v47 = vld [vmem:[%s1582_s2 + $0x30] sm:$0xff] }
  0xde   :  { %v148_v48 = vpop.f32.mrf.mxu0 }
  0xe1   :  { %195 = vmatmul.f32.gmra.mxu0 %v83_v49  ;;  %v259_v49 = vld [vmem:[%s1583_s0 + $0x38] sm:$0xff] }
  0xe6   :  { %v151_v50 = vpop.f32.mrf.mxu0 }
  0xe9   :  { %198 = vmatmul.f32.gmra.mxu0 %v84_v51  ;;  %v266_v51 = vld [vmem:[%s1583_s0 + $0x70] sm:$0xff] }
  0xee   :  { %v154_v52 = vpop.f32.mrf.mxu0 }
  0xf1   :  { %201 = vmatmul.f32.gmra.mxu0 %v85_v53  ;;  %v649_v53 = vld [vmem:[%s1582_s2 + $0x40] sm:$0xff] }
  0xf6   :  { %v157_v54 = vpop.f32.mrf.mxu0 }
  0xf9   :  { %204 = vmatmul.f32.gmra.mxu0 %v86_v55  ;;  %v263_v55 = vld [vmem:[%s1583_s0 + $0x58] sm:$0xff] }
  0xfe   :  { %v160_v56 = vpop.f32.mrf.mxu0 }
 0x101   :  { %207 = vmatmul.f32.gmra.mxu0 %v87_v57  ;;  %v270_v57 = vld [vmem:[%s1583_s0 + $0x90] sm:$0xff] }
 0x106   :  { %v163_v58 = vpop.f32.mrf.mxu0 }
 0x109   :  { %210 = vmatmul.f32.gmra.mxu0 %v88_v59  ;;  %v651_v59 = vld [vmem:[%s1582_s2 + $0x50] sm:$0xff] }
 0x10e   :  { %v166_v60 = vpop.f32.mrf.mxu0 }
 0x111   :  { %213 = vmatmul.f32.gmra.mxu0 %v89_v61  ;;  %v267_v61 = vld [vmem:[%s1583_s0 + $0x78] sm:$0xff] }
 0x116   :  { %v169_v62 = vpop.f32.mrf.mxu0 }
 0x117   :  { %316 = vmatpush.msra.mxu1 %v169_v62  ;;  %v652_v62 = vld [vmem:[%s1582_s2 + $0x58] sm:$0xff] }
 0x119   :  { %216 = vmatmul.f32.gmra.mxu0 %v90_v63  ;;  %317 = vmatpush.msra.mxu1 %v166_v60  ;;  %v272_v60 = vld [vmem:[%s1583_s0 + $0xa0] sm:$0xff]  ;;  %v274_v63 = vld [vmem:[%s1583_s0 + $0xb0] sm:$0xff] }
 0x11b   :  { %318 = vmatpush.msra.mxu1 %v163_v58  ;;  %v265_v58 = vld [vmem:[%s1583_s0 + $0x68] sm:$0xff] }
 0x11d   :  { %319 = vmatpush.msra.mxu1 %v160_v56  ;;  %v650_v56 = vld [vmem:[%s1582_s2 + $0x48] sm:$0xff] }
 0x11e   :  { %v1088_v0 = vpop.f32.mrf.mxu0 }
 0x11f   :  { %320 = vmatpush.msra.mxu1 %v157_v54  ;;  %v268_v54 = vld [vmem:[%s1583_s0 + $0x80] sm:$0xff] }
 0x121   :  { %321 = vmatpush.msra.mxu1 %v154_v52  ;;  %v261_v52 = vld [vmem:[%s1583_s0 + $0x48] sm:$0xff] }
 0x123   :  { %322 = vmatpush.msra.mxu1 %v151_v50  ;;  %v648_v50 = vld [vmem:[%s1582_s2 + $0x38] sm:$0xff] }
 0x125   :  { %323 = vmatpush.msra.mxu1 %v148_v48  ;;  %v264_v48 = vld [vmem:[%s1583_s0 + $0x60] sm:$0xff] }
 0x126   :  { %v1090_v1 = vpop.f32.mrf.mxu0 }
 0x127   :  { %324 = vmatpush.msra.mxu1 %v145_v46  ;;  %v257_v46 = vld [vmem:[%s1583_s0 + $0x28] sm:$0xff] }
 0x129   :  { %325 = vmatpush.msra.mxu1 %v142_v44  ;;  %v646_v44 = vld [vmem:[%s1582_s2 + $0x28] sm:$0xff] }
 0x12b   :  { %326 = vmatpush.msra.mxu1 %v139_v42  ;;  %v260_v42 = vld [vmem:[%s1583_s0 + $0x40] sm:$0xff] }
 0x12d   :  { %327 = vmatpush.msra.mxu1 %v136_v40  ;;  %v253_v40 = vld [vmem:[%s1583_s0 + $0x8] sm:$0xff] }
 0x12e   :  { %v1092_v2 = vpop.f32.mrf.mxu0 }
 0x12f   :  { %328 = vmatpush.msra.mxu1 %v133_v38  ;;  %v644_v38 = vld [vmem:[%s1582_s2 + $0x18] sm:$0xff] }
 0x131   :  { %329 = vmatpush.msra.mxu1 %v130_v36  ;;  %v643_v36 = vld [vmem:[%s1582_s2 + $0x10] sm:$0xff] }
 0x133   :  { %330 = vmatpush.msra.mxu1 %v127_v34  ;;  %v642_v34 = vld [vmem:[%s1582_s2 + $0x8] sm:$0xff] }
 0x135   :  { %331 = vmatpush.msra.mxu1 %v1038_v32  ;;  %v641_v32 = vld [vmem:[%s1582_s2] sm:$0xff] }
 0x136   :  { %v1095_v3 = vpop.f32.mrf.mxu0  ;;  %705 = vmatmul.f32.vlgmr.msra.gmra.mxu3 %v641_v32  ;;  %332 = vmatmul.f32.vlgmr.msra.gmra.mxu1 %v252_v33  ;;  %v290_v32 = vld [vmem:[%s1583_s0 + $0x130] sm:$0xff]  ;;  %v661_v33 = vld [vmem:[%s1582_s2 + $0xa0] sm:$0xff] }
 0x13e   :  { %v1097_v4 = vpop.f32.mrf.mxu0  ;;  %708 = vmatmul.f32.gmra.mxu3 %v642_v34  ;;  %335 = vmatmul.f32.gmra.mxu1 %v254_v35 }
 0x146   :  { %v1099_v5 = vpop.f32.mrf.mxu0  ;;  %711 = vmatmul.f32.gmra.mxu3 %v643_v36  ;;  %338 = vmatmul.f32.gmra.mxu1 %v256_v37  ;;  %v1335_v37 = vld [vmem:[%s1584_s5] ss:$0 sm:$0xff] }
 0x14e   :  { %v1101_v6 = vpop.f32.mrf.mxu0  ;;  %714 = vmatmul.f32.gmra.mxu3 %v644_v38  ;;  %341 = vmatmul.f32.gmra.mxu1 %v258_v39  ;;  %v287_v38 = vld [vmem:[%s1583_s0 + $0x118] sm:$0xff] }
 0x156   :  { %v193_v7 = vpop.f32.mrf.mxu0  ;;  %717 = vmatmul.f32.gmra.mxu3 %v645_v41  ;;  %344 = vmatmul.f32.gmra.mxu1 %v260_v42 }
 0x15e   :  { %v196_v8 = vpop.f32.mrf.mxu0  ;;  %720 = vmatmul.f32.gmra.mxu3 %v646_v44  ;;  %347 = vmatmul.f32.gmra.mxu1 %v262_v45 }
 0x166   :  { %v199_v9 = vpop.f32.mrf.mxu0  ;;  %723 = vmatmul.f32.gmra.mxu3 %v647_v47  ;;  %350 = vmatmul.f32.gmra.mxu1 %v264_v48  ;;  %v289_v47 = vld [vmem:[%s1583_s0 + $0x128] sm:$0xff] }
 0x16e   :  { %v202_v10 = vpop.f32.mrf.mxu0  ;;  %726 = vmatmul.f32.gmra.mxu3 %v648_v50  ;;  %353 = vmatmul.f32.gmra.mxu1 %v266_v51 }
 0x176   :  { %v205_v11 = vpop.f32.mrf.mxu0  ;;  %729 = vmatmul.f32.gmra.mxu3 %v649_v53  ;;  %356 = vmatmul.f32.gmra.mxu1 %v268_v54 }
 0x17e   :  { %v208_v15 = vpop.f32.mrf.mxu0  ;;  %732 = vmatmul.f32.gmra.mxu3 %v650_v56  ;;  %359 = vmatmul.f32.gmra.mxu1 %v270_v57  ;;  %v291_v56 = vld [vmem:[%s1583_s0 + $0x138] sm:$0xff] }
 0x186   :  { %v211_v20 = vpop.f32.mrf.mxu0  ;;  %735 = vmatmul.f32.gmra.mxu3 %v651_v59  ;;  %362 = vmatmul.f32.gmra.mxu1 %v272_v60 }
 0x18e   :  { %v214_v25 = vpop.f32.mrf.mxu0  ;;  %738 = vmatmul.f32.gmra.mxu3 %v652_v62  ;;  %365 = vmatmul.f32.gmra.mxu1 %v274_v63 }
 0x196   :  { %v217_v30 = vpop.f32.mrf.mxu0 }
 0x197   :  { %429 = vmatpush.msra.mxu2 %v217_v30  ;;  %v285_v30 = vld [vmem:[%s1583_s0 + $0x108] sm:$0xff] }
 0x199   :  { %430 = vmatpush.msra.mxu2 %v214_v25  ;;  %v283_v25 = vld [vmem:[%s1583_s0 + $0xf8] sm:$0xff] }
 0x19b   :  { %431 = vmatpush.msra.mxu2 %v211_v20  ;;  %v281_v20 = vld [vmem:[%s1583_s0 + $0xe8] sm:$0xff] }
 0x19d   :  { %432 = vmatpush.msra.mxu2 %v208_v15  ;;  %v279_v15 = vld [vmem:[%s1583_s0 + $0xd8] sm:$0xff] }
 0x19f   :  { %433 = vmatpush.msra.mxu2 %v205_v11  ;;  %v282_v11 = vld [vmem:[%s1583_s0 + $0xf0] sm:$0xff] }
 0x1a1   :  { %434 = vmatpush.msra.mxu2 %v202_v10  ;;  %v656_v10 = vld [vmem:[%s1582_s2 + $0x78] sm:$0xff] }
 0x1a3   :  { %435 = vmatpush.msra.mxu2 %v199_v9  ;;  %v275_v9 = vld [vmem:[%s1583_s0 + $0xb8] sm:$0xff] }
 0x1a5   :  { %436 = vmatpush.msra.mxu2 %v196_v8  ;;  %v280_v8 = vld [vmem:[%s1583_s0 + $0xe0] sm:$0xff] }
 0x1a7   :  { %437 = vmatpush.msra.mxu2 %v193_v7  ;;  %v655_v7 = vld [vmem:[%s1582_s2 + $0x70] sm:$0xff] }
 0x1a9   :  { %438 = vmatpush.msra.mxu2 %v1101_v6  ;;  %v273_v6 = vld [vmem:[%s1583_s0 + $0xa8] sm:$0xff] }
 0x1ab   :  { %439 = vmatpush.msra.mxu2 %v1099_v5  ;;  %v278_v5 = vld [vmem:[%s1583_s0 + $0xd0] sm:$0xff] }
 0x1ad   :  { %440 = vmatpush.msra.mxu2 %v1097_v4  ;;  %v654_v4 = vld [vmem:[%s1582_s2 + $0x68] sm:$0xff] }
 0x1af   :  { %441 = vmatpush.msra.mxu2 %v1095_v3  ;;  %v271_v3 = vld [vmem:[%s1583_s0 + $0x98] sm:$0xff] }
 0x1b1   :  { %442 = vmatpush.msra.mxu2 %v1092_v2  ;;  %v276_v2 = vld [vmem:[%s1583_s0 + $0xc0] sm:$0xff] }
 0x1b2   :  { %368 = vmatmul.f32.gmra.mxu1 %v276_v2 }
 0x1b3   :  { %443 = vmatpush.msra.mxu2 %v1090_v1  ;;  %v653_v1 = vld [vmem:[%s1582_s2 + $0x60] sm:$0xff]  ;;  %v333_v14 = vpop.f32.mrf.mxu1 }
 0x1b4   :  { %741 = vmatmul.f32.gmra.mxu3 %v653_v1  ;;  %v293_v1 = vld [vmem:[%s1583_s0 + $0x148] sm:$0xff] }
 0x1b5   :  { %444 = vmatpush.msra.mxu2 %v1088_v0  ;;  %v269_v0 = vld [vmem:[%s1583_s0 + $0x88] sm:$0xff] }
 0x1b6   :  { %445 = vmatmul.f32.vlgmr.msra.gmra.mxu2 %v253_v40  ;;  %v292_v40 = vld [vmem:[%s1583_s0 + $0x140] sm:$0xff] }
 0x1b9   :  { %v706_v16 = vpop.f32.mrf.mxu3 }
 0x1ba   :  { %371 = vmatmul.f32.gmra.mxu1 %v278_v5 }
 0x1bb   :  { %v336_v19 = vpop.f32.mrf.mxu1 }
 0x1bc   :  { %744 = vmatmul.f32.gmra.mxu3 %v654_v4 }
 0x1be   :  { %448 = vmatmul.f32.gmra.mxu2 %v255_v43  ;;  %v662_v43 = vld [vmem:[%s1582_s2 + $0xa8] sm:$0xff] }
 0x1c1   :  { %v709_v21 = vpop.f32.mrf.mxu3 }
 0x1c2   :  { %374 = vmatmul.f32.gmra.mxu1 %v280_v8 }
 0x1c3   :  { %v339_v24 = vpop.f32.mrf.mxu1 }
 0x1c4   :  { %747 = vmatmul.f32.gmra.mxu3 %v655_v7 }
 0x1c6   :  { %451 = vmatmul.f32.gmra.mxu2 %v257_v46 }
 0x1c9   :  { %v712_v26 = vpop.f32.mrf.mxu3 }
 0x1ca   :  { %377 = vmatmul.f32.gmra.mxu1 %v282_v11 }
 0x1cb   :  { %v342_v29 = vpop.f32.mrf.mxu1 }
 0x1cc   :  { %750 = vmatmul.f32.gmra.mxu3 %v656_v10  ;;  %v295_v10 = vld [vmem:[%s1583_s0 + $0x158] sm:$0xff] }
 0x1ce   :  { %454 = vmatmul.f32.gmra.mxu2 %v259_v49  ;;  %v294_v49 = vld [vmem:[%s1583_s0 + $0x150] sm:$0xff] }
 0x1d1   :  { %v715_v31 = vpop.f32.mrf.mxu3 }
 0x1d2   :  { %380 = vmatmul.f32.gmra.mxu1 %v284_v17 }
 0x1d3   :  { %v345_v34 = vpop.f32.mrf.mxu1 }
 0x1d4   :  { %753 = vmatmul.f32.gmra.mxu3 %v657_v13 }
 0x1d6   :  { %457 = vmatmul.f32.gmra.mxu2 %v261_v52  ;;  %v663_v52 = vld [vmem:[%s1582_s2 + $0xb0] sm:$0xff] }
 0x1d9   :  { %v718_v39 = vpop.f32.mrf.mxu3 }
 0x1da   :  { %383 = vmatmul.f32.gmra.mxu1 %v286_v22 }
 0x1db   :  { %v348_v44 = vpop.f32.mrf.mxu1 }
 0x1dc   :  { %756 = vmatmul.f32.gmra.mxu3 %v658_v18 }
 0x1de   :  { %460 = vmatmul.f32.gmra.mxu2 %v263_v55 }
 0x1e1   :  { %v721_v48 = vpop.f32.mrf.mxu3 }
 0x1e2   :  { %386 = vmatmul.f32.gmra.mxu1 %v288_v27 }
 0x1e3   :  { %v351_v53 = vpop.f32.mrf.mxu1 }
 0x1e4   :  { %759 = vmatmul.f32.gmra.mxu3 %v659_v23 }
 0x1e6   :  { %463 = vmatmul.f32.gmra.mxu2 %v265_v58  ;;  %v296_v58 = vld [vmem:[%s1583_s0 + $0x160] sm:$0xff] }
 0x1e9   :  { %v724_v57 = vpop.f32.mrf.mxu3 }
 0x1ea   :  { %389 = vmatmul.f32.gmra.mxu1 %v290_v32 }
 0x1eb   :  { %v354_v62 = vpop.f32.mrf.mxu1 }
 0x1ec   :  { %762 = vmatmul.f32.gmra.mxu3 %v660_v28  ;;  %v299_v28 = vld [vmem:[%s1583_s0 + $0x178] sm:$0xff] }
 0x1ee   :  { %466 = vmatmul.f32.gmra.mxu2 %v267_v61  ;;  %v664_v61 = vld [vmem:[%s1582_s2 + $0xb8] sm:$0xff] }
 0x1f1   :  { %v727_v2 = vpop.f32.mrf.mxu3 }
 0x1f2   :  { %392 = vmatmul.f32.gmra.mxu1 %v292_v40  ;;  %v306_v40 = vld [vmem:[%s1583_s0 + $0x1b0] sm:$0xff] }
 0x1f3   :  { %v357_v7 = vpop.f32.mrf.mxu1 }
 0x1f4   :  { %765 = vmatmul.f32.gmra.mxu3 %v661_v33  ;;  %v668_v33 = vld [vmem:[%s1582_s2 + $0xd8] sm:$0xff] }
 0x1f6   :  { %469 = vmatmul.f32.gmra.mxu2 %v269_v0 }
 0x1f9   :  { %v730_v11 = vpop.f32.mrf.mxu3 }
 0x1fa   :  { %395 = vmatmul.f32.gmra.mxu1 %v294_v49  ;;  %v308_v49 = vld [vmem:[%s1583_s0 + $0x1c0] sm:$0xff] }
 0x1fc   :  { %768 = vmatmul.f32.gmra.mxu3 %v662_v43  ;;  %v669_v43 = vld [vmem:[%s1582_s2 + $0xe0] sm:$0xff] }
 0x1fe   :  { %472 = vmatmul.f32.gmra.mxu2 %v271_v3  ;;  %v298_v3 = vld [vmem:[%s1583_s0 + $0x170] sm:$0xff] }
 0x202   :  { %398 = vmatmul.f32.gmra.mxu1 %v296_v58  ;;  %v310_v58 = vld [vmem:[%s1583_s0 + $0x1d0] sm:$0xff] }
 0x204   :  { %771 = vmatmul.f32.gmra.mxu3 %v663_v52  ;;  %v670_v52 = vld [vmem:[%s1582_s2 + $0xe8] sm:$0xff] }
 0x206   :  { %475 = vmatmul.f32.gmra.mxu2 %v273_v6  ;;  %v665_v6 = vld [vmem:[%s1582_s2 + $0xc0] sm:$0xff] }
 0x20a   :  { %401 = vmatmul.f32.gmra.mxu1 %v298_v3  ;;  %v312_v3 = vld [vmem:[%s1583_s0 + $0x1e0] sm:$0xff] }
 0x20c   :  { %774 = vmatmul.f32.gmra.mxu3 %v664_v61  ;;  %v671_v61 = vld [vmem:[%s1582_s2 + $0xf0] sm:$0xff] }
 0x20e   :  { %478 = vmatmul.f32.gmra.mxu2 %v275_v9 }
 0x214   :  { %777 = vmatmul.f32.gmra.mxu3 %v665_v6  ;;  %v672_v6 = vld [vmem:[%s1582_s2 + $0xf8] sm:$0xff] }
 0x216   :  { %481 = vmatmul.f32.gmra.mxu2 %v277_v12  ;;  %v300_v12 = vld [vmem:[%s1583_s0 + $0x180] sm:$0xff] }
 0x217   :  { %404 = vmatmul.f32.gmra.mxu1 %v300_v12  ;;  %v314_v12 = vld [vmem:[%s1583_s0 + $0x1f0] sm:$0xff] }
 0x21e   :  { %484 = vmatmul.f32.gmra.mxu2 %v279_v15  ;;  %v666_v15 = vld [vmem:[%s1582_s2 + $0xc8] sm:$0xff] }
 0x21f   :  { %780 = vmatmul.f32.gmra.mxu3 %v666_v15 }
 0x226   :  { %487 = vmatmul.f32.gmra.mxu2 %v281_v20  ;;  %v733_v20 = vpop.f32.mrf.mxu3 }
 0x22e   :  { %490 = vmatmul.f32.gmra.mxu2 %v283_v25 }
 0x236   :  { %493 = vmatmul.f32.gmra.mxu2 %v285_v30  ;;  %v304_v30 = vld [vmem:[%s1583_s0 + $0x1a0] sm:$0xff] }
 0x239   :  { %v446_v35 = vpop.f32.mrf.mxu2 }
 0x23a   :  { %v447_v36 = vadd.f32 %v446_v35, %v333_v14 }
 0x23c   :  { %v802_v41 = vadd.f32 %v706_v16, %v447_v36  ;;  %v360_v16 = vpop.f32.mrf.mxu1 }
 0x23e   :  { %v838_v42 = vadd.f32 %v1335_v37, %v802_v41  ;;  %496 = vmatmul.f32.gmra.mxu2 %v287_v38  ;;  %v301_v38 = vld [vmem:[%s1583_s0 + $0x188] sm:$0xff] }
 0x240   :  { %870 = vst [vmem:[%s1585_s6] sm:$0xff] %v838_v42 }
 0x241   :  { %v449_v45 = vpop.f32.mrf.mxu2 }
 0x242   :  { %v450_v46 = vadd.f32 %v449_v45, %v336_v19  ;;  %v297_v19 = vld [vmem:[%s1583_s0 + $0x168] sm:$0xff] }
 0x244   :  { %v803_v50 = vadd.f32 %v709_v21, %v450_v46  ;;  %v302_v21 = vld [vmem:[%s1583_s0 + $0x190] sm:$0xff]  ;;  %v363_v25 = vpop.f32.mrf.mxu1 }
 0x245   :  { %407 = vmatmul.f32.gmra.mxu1 %v302_v21 }
 0x246   :  { %v839_v51 = vadd.f32 %v1335_v37, %v803_v50  ;;  %499 = vmatmul.f32.gmra.mxu2 %v289_v47  ;;  %v303_v47 = vld [vmem:[%s1583_s0 + $0x198] sm:$0xff] }
 0x248   :  { %871 = vst [vmem:[%s1585_s6 + $0x8] sm:$0xff] %v839_v51 }
 0x249   :  { %v452_v54 = vpop.f32.mrf.mxu2 }
 0x24a   :  { %v453_v55 = vadd.f32 %v452_v54, %v339_v24  ;;  %v667_v24 = vld [vmem:[%s1582_s2 + $0xd0] sm:$0xff] }
 0x24b   :  { %783 = vmatmul.f32.gmra.mxu3 %v667_v24  ;;  %v313_v24 = vld [vmem:[%s1583_s0 + $0x1e8] sm:$0xff] }
 0x24c   :  { %v804_v59 = vadd.f32 %v712_v26, %v453_v55 }
 0x24d   :  { %410 = vmatmul.f32.gmra.mxu1 %v304_v30 }
 0x24e   :  { %v840_v60 = vadd.f32 %v1335_v37, %v804_v59  ;;  %502 = vmatmul.f32.gmra.mxu2 %v291_v56  ;;  %v305_v56 = vld [vmem:[%s1583_s0 + $0x1a8] sm:$0xff] }
 0x250   :  { %872 = vst [vmem:[%s1585_s6 + $0x10] sm:$0xff] %v840_v60 }
 0x251   :  { %v455_v63 = vpop.f32.mrf.mxu2 }
 0x252   :  { %v456_v0 = vadd.f32 %v455_v63, %v342_v29  ;;  %v736_v29 = vpop.f32.mrf.mxu3 }
 0x253   :  { %786 = vmatmul.f32.gmra.mxu3 %v668_v33 }
 0x254   :  { %v805_v4 = vadd.f32 %v715_v31, %v456_v0 }
 0x255   :  { %413 = vmatmul.f32.gmra.mxu1 %v306_v40 }
 0x256   :  { %v841_v5 = vadd.f32 %v1335_v37, %v805_v4  ;;  %505 = vmatmul.f32.gmra.mxu2 %v293_v1  ;;  %v307_v1 = vld [vmem:[%s1583_s0 + $0x1b8] sm:$0xff] }
 0x258   :  { %873 = vst [vmem:[%s1585_s6 + $0x18] sm:$0xff] %v841_v5 }
 0x259   :  { %v458_v8 = vpop.f32.mrf.mxu2 }
 0x25a   :  { %v459_v9 = vadd.f32 %v458_v8, %v345_v34  ;;  %v366_v34 = vpop.f32.mrf.mxu1 }
 0x25b   :  { %789 = vmatmul.f32.gmra.mxu3 %v669_v43 }
 0x25c   :  { %v806_v13 = vadd.f32 %v718_v39, %v459_v9  ;;  %v739_v39 = vpop.f32.mrf.mxu3 }
 0x25d   :  { %416 = vmatmul.f32.gmra.mxu1 %v308_v49 }
 0x25e   :  { %v842_v14 = vadd.f32 %v1335_v37, %v806_v13  ;;  %508 = vmatmul.f32.gmra.mxu2 %v295_v10  ;;  %v309_v10 = vld [vmem:[%s1583_s0 + $0x1c8] sm:$0xff] }
 0x260   :  { %874 = vst [vmem:[%s1585_s6 + $0x20] sm:$0xff] %v842_v14 }
 0x261   :  { %v461_v17 = vpop.f32.mrf.mxu2 }
 0x262   :  { %v462_v18 = vadd.f32 %v461_v17, %v348_v44  ;;  %v369_v44 = vpop.f32.mrf.mxu1 }
 0x263   :  { %792 = vmatmul.f32.gmra.mxu3 %v670_v52 }
 0x264   :  { %v807_v22 = vadd.f32 %v721_v48, %v462_v18  ;;  %v742_v48 = vpop.f32.mrf.mxu3  ;;  %v311_v18 = vld [vmem:[%s1583_s0 + $0x1d8] sm:$0xff] }
 0x265   :  { %419 = vmatmul.f32.gmra.mxu1 %v310_v58 }
 0x266   :  { %v843_v23 = vadd.f32 %v1335_v37, %v807_v22  ;;  %511 = vmatmul.f32.gmra.mxu2 %v297_v19 }
 0x268   :  { %875 = vst [vmem:[%s1585_s6 + $0x28] sm:$0xff] %v843_v23 }
 0x269   :  { %v464_v26 = vpop.f32.mrf.mxu2 }
 0x26a   :  { %v465_v27 = vadd.f32 %v464_v26, %v351_v53  ;;  %v372_v53 = vpop.f32.mrf.mxu1 }
 0x26b   :  { %795 = vmatmul.f32.gmra.mxu3 %v671_v61 }
 0x26c   :  { %v808_v31 = vadd.f32 %v724_v57, %v465_v27  ;;  %v745_v57 = vpop.f32.mrf.mxu3 }
 0x26d   :  { %422 = vmatmul.f32.gmra.mxu1 %v312_v3 }
 0x26e   :  { %v844_v32 = vadd.f32 %v1335_v37, %v808_v31  ;;  %514 = vmatmul.f32.gmra.mxu2 %v299_v28  ;;  %v315_v31 = vld [vmem:[%s1583_s0 + $0x1f8] sm:$0xff] }
 0x270   :  { %876 = vst [vmem:[%s1585_s6 + $0x30] sm:$0xff] %v844_v32 }
 0x271   :  { %v467_v35 = vpop.f32.mrf.mxu2 }
 0x272   :  { %v468_v36 = vadd.f32 %v467_v35, %v354_v62  ;;  %v375_v62 = vpop.f32.mrf.mxu1 }
 0x273   :  { %798 = vmatmul.f32.gmra.mxu3 %v672_v6 }
 0x274   :  { %v809_v41 = vadd.f32 %v727_v2, %v468_v36  ;;  %v748_v2 = vpop.f32.mrf.mxu3 }
 0x275   :  { %425 = vmatmul.f32.gmra.mxu1 %v314_v12 }
 0x276   :  { %v845_v42 = vadd.f32 %v1335_v37, %v809_v41  ;;  %517 = vmatmul.f32.gmra.mxu2 %v301_v38 }
 0x278   :  { %877 = vst [vmem:[%s1585_s6 + $0x38] sm:$0xff] %v845_v42 }
 0x279   :  { %v470_v45 = vpop.f32.mrf.mxu2 }
 0x27a   :  { %v471_v46 = vadd.f32 %v470_v45, %v357_v7  ;;  %v378_v7 = vpop.f32.mrf.mxu1 }
 0x27c   :  { %v810_v50 = vadd.f32 %v730_v11, %v471_v46  ;;  %v751_v11 = vpop.f32.mrf.mxu3 }
 0x27e   :  { %v846_v51 = vadd.f32 %v1335_v37, %v810_v50  ;;  %520 = vmatmul.f32.gmra.mxu2 %v303_v47 }
 0x280   :  { %878 = vst [vmem:[%s1585_s6 + $0x40] sm:$0xff] %v846_v51 }
 0x281   :  { %v473_v54 = vpop.f32.mrf.mxu2 }
 0x282   :  { %v474_v55 = vadd.f32 %v473_v54, %v360_v16  ;;  %v381_v16 = vpop.f32.mrf.mxu1 }
 0x284   :  { %v811_v59 = vadd.f32 %v733_v20, %v474_v55  ;;  %v754_v19 = vpop.f32.mrf.mxu3 }
 0x286   :  { %v847_v60 = vadd.f32 %v1335_v37, %v811_v59  ;;  %523 = vmatmul.f32.gmra.mxu2 %v305_v56 }
 0x288   :  { %879 = vst [vmem:[%s1585_s6 + $0x48] sm:$0xff] %v847_v60 }
 0x289   :  { %v476_v63 = vpop.f32.mrf.mxu2 }
 0x28a   :  { %v477_v0 = vadd.f32 %v476_v63, %v363_v25  ;;  %v384_v25 = vpop.f32.mrf.mxu1 }
 0x28c   :  { %v812_v4 = vadd.f32 %v736_v29, %v477_v0  ;;  %v757_v27 = vpop.f32.mrf.mxu3 }
 0x28e   :  { %v848_v5 = vadd.f32 %v1335_v37, %v812_v4  ;;  %526 = vmatmul.f32.gmra.mxu2 %v307_v1 }
 0x290   :  { %880 = vst [vmem:[%s1585_s6 + $0x50] sm:$0xff] %v848_v5 }
 0x291   :  { %v479_v8 = vpop.f32.mrf.mxu2 }
 0x292   :  { %v480_v9 = vadd.f32 %v479_v8, %v366_v34  ;;  %v387_v33 = vpop.f32.mrf.mxu1 }
 0x294   :  { %v813_v13 = vadd.f32 %v739_v39, %v480_v9  ;;  %v760_v35 = vpop.f32.mrf.mxu3 }
 0x296   :  { %v849_v14 = vadd.f32 %v1335_v37, %v813_v13  ;;  %529 = vmatmul.f32.gmra.mxu2 %v309_v10 }
 0x298   :  { %881 = vst [vmem:[%s1585_s6 + $0x58] sm:$0xff] %v849_v14 }
 0x299   :  { %v482_v15 = vpop.f32.mrf.mxu2 }
 0x29a   :  { %v483_v17 = vadd.f32 %v482_v15, %v369_v44  ;;  %v390_v41 = vpop.f32.mrf.mxu1 }
 0x29c   :  { %v814_v20 = vadd.f32 %v742_v48, %v483_v17  ;;  %v763_v43 = vpop.f32.mrf.mxu3 }
 0x29e   :  { %v850_v21 = vadd.f32 %v1335_v37, %v814_v20  ;;  %532 = vmatmul.f32.gmra.mxu2 %v311_v18 }
 0x2a0   :  { %882 = vst [vmem:[%s1585_s6 + $0x60] sm:$0xff] %v850_v21 }
 0x2a1   :  { %v485_v22 = vpop.f32.mrf.mxu2 }
 0x2a2   :  { %v486_v23 = vadd.f32 %v485_v22, %v372_v53  ;;  %v393_v48 = vpop.f32.mrf.mxu1 }
 0x2a4   :  { %v815_v26 = vadd.f32 %v745_v57, %v486_v23  ;;  %v766_v50 = vpop.f32.mrf.mxu3 }
 0x2a6   :  { %v851_v28 = vadd.f32 %v1335_v37, %v815_v26  ;;  %535 = vmatmul.f32.gmra.mxu2 %v313_v24 }
 0x2a8   :  { %883 = vst [vmem:[%s1585_s6 + $0x68] sm:$0xff] %v851_v28 }
 0x2a9   :  { %v488_v29 = vpop.f32.mrf.mxu2 }
 0x2aa   :  { %v489_v30 = vadd.f32 %v488_v29, %v375_v62  ;;  %v396_v55 = vpop.f32.mrf.mxu1 }
 0x2ac   :  { %v816_v32 = vadd.f32 %v748_v2, %v489_v30  ;;  %v769_v57 = vpop.f32.mrf.mxu3 }
 0x2ae   :  { %v852_v34 = vadd.f32 %v1335_v37, %v816_v32  ;;  %538 = vmatmul.f32.gmra.mxu2 %v315_v31 }
 0x2b0   :  { %884 = vst [vmem:[%s1585_s6 + $0x70] sm:$0xff] %v852_v34 }
 0x2b1   :  { %v491_v36 = vpop.f32.mrf.mxu2 }
 0x2b2   :  { %v492_v38 = vadd.f32 %v491_v36, %v378_v7  ;;  %v399_v62 = vpop.f32.mrf.mxu1 }
 0x2b4   :  { %v817_v39 = vadd.f32 %v751_v11, %v492_v38  ;;  %v772_v0 = vpop.f32.mrf.mxu3 }
 0x2b6   :  { %v853_v40 = vadd.f32 %v1335_v37, %v817_v39 }
 0x2b8   :  { %885 = vst [vmem:[%s1585_s6 + $0x78] sm:$0xff] %v853_v40 }
 0x2b9   :  { %v494_v42 = vpop.f32.mrf.mxu2 }
 0x2ba   :  { %v495_v44 = vadd.f32 %v494_v42, %v381_v16  ;;  %v402_v5 = vpop.f32.mrf.mxu1 }
 0x2bc   :  { %v818_v45 = vadd.f32 %v754_v19, %v495_v44  ;;  %v775_v7 = vpop.f32.mrf.mxu3 }
 0x2be   :  { %v854_v46 = vadd.f32 %v1335_v37, %v818_v45 }
 0x2c0   :  { %886 = vst [vmem:[%s1585_s6 + $0x80] sm:$0xff] %v854_v46 }
 0x2c1   :  { %v497_v47 = vpop.f32.mrf.mxu2 }
 0x2c2   :  { %v498_v49 = vadd.f32 %v497_v47, %v384_v25  ;;  %v405_v12 = vpop.f32.mrf.mxu1 }
 0x2c4   :  { %v819_v51 = vadd.f32 %v757_v27, %v498_v49  ;;  %v778_v14 = vpop.f32.mrf.mxu3 }
 0x2c6   :  { %v855_v52 = vadd.f32 %v1335_v37, %v819_v51 }
 0x2c8   :  { %887 = vst [vmem:[%s1585_s6 + $0x88] sm:$0xff] %v855_v52 }
 0x2c9   :  { %v500_v53 = vpop.f32.mrf.mxu2 }
 0x2ca   :  { %v501_v54 = vadd.f32 %v500_v53, %v387_v33  ;;  %v408_v19 = vpop.f32.mrf.mxu1 }
 0x2cc   :  { %v820_v56 = vadd.f32 %v760_v35, %v501_v54  ;;  %v781_v21 = vpop.f32.mrf.mxu3 }
 0x2ce   :  { %v856_v58 = vadd.f32 %v1335_v37, %v820_v56 }
 0x2d0   :  { %888 = vst [vmem:[%s1585_s6 + $0x90] sm:$0xff] %v856_v58 }
 0x2d1   :  { %v503_v59 = vpop.f32.mrf.mxu2 }
 0x2d2   :  { %v504_v60 = vadd.f32 %v503_v59, %v390_v41  ;;  %v411_v26 = vpop.f32.mrf.mxu1 }
 0x2d4   :  { %v821_v61 = vadd.f32 %v763_v43, %v504_v60  ;;  %v784_v28 = vpop.f32.mrf.mxu3 }
 0x2d6   :  { %v857_v63 = vadd.f32 %v1335_v37, %v821_v61 }
 0x2d8   :  { %889 = vst [vmem:[%s1585_s6 + $0x98] sm:$0xff] %v857_v63 }
 0x2d9   :  { %v506_v1 = vpop.f32.mrf.mxu2 }
 0x2da   :  { %v507_v2 = vadd.f32 %v506_v1, %v393_v48  ;;  %v414_v33 = vpop.f32.mrf.mxu1 }
 0x2dc   :  { %v822_v3 = vadd.f32 %v766_v50, %v507_v2  ;;  %v787_v35 = vpop.f32.mrf.mxu3 }
 0x2de   :  { %v858_v4 = vadd.f32 %v1335_v37, %v822_v3 }
 0x2e0   :  { %890 = vst [vmem:[%s1585_s6 + $0xa0] sm:$0xff] %v858_v4 }
 0x2e1   :  { %v509_v6 = vpop.f32.mrf.mxu2 }
 0x2e2   :  { %v510_v8 = vadd.f32 %v509_v6, %v396_v55  ;;  %v417_v41 = vpop.f32.mrf.mxu1 }
 0x2e4   :  { %v823_v9 = vadd.f32 %v769_v57, %v510_v8  ;;  %v790_v43 = vpop.f32.mrf.mxu3 }
 0x2e6   :  { %v859_v10 = vadd.f32 %v1335_v37, %v823_v9 }
 0x2e8   :  { %891 = vst [vmem:[%s1585_s6 + $0xa8] sm:$0xff] %v859_v10 }
 0x2e9   :  { %v512_v11 = vpop.f32.mrf.mxu2 }
 0x2ea   :  { %v513_v13 = vadd.f32 %v512_v11, %v399_v62  ;;  %v420_v48 = vpop.f32.mrf.mxu1 }
 0x2ec   :  { %v824_v15 = vadd.f32 %v772_v0, %v513_v13  ;;  %v793_v50 = vpop.f32.mrf.mxu3 }
 0x2ee   :  { %v860_v16 = vadd.f32 %v1335_v37, %v824_v15 }
 0x2f0   :  { %892 = vst [vmem:[%s1585_s6 + $0xb0] sm:$0xff] %v860_v16 }
 0x2f1   :  { %v515_v17 = vpop.f32.mrf.mxu2 }
 0x2f2   :  { %v516_v18 = vadd.f32 %v515_v17, %v402_v5  ;;  %v423_v55 = vpop.f32.mrf.mxu1 }
 0x2f4   :  { %v825_v20 = vadd.f32 %v775_v7, %v516_v18  ;;  %v796_v57 = vpop.f32.mrf.mxu3 }
 0x2f6   :  { %v861_v22 = vadd.f32 %v1335_v37, %v825_v20 }
 0x2f8   :  { %893 = vst [vmem:[%s1585_s6 + $0xb8] sm:$0xff] %v861_v22 }
 0x2f9   :  { %v518_v23 = vpop.f32.mrf.mxu2 }
 0x2fa   :  { %v519_v24 = vadd.f32 %v518_v23, %v405_v12  ;;  %v426_v62 = vpop.f32.mrf.mxu1 }
 0x2fc   :  { %v826_v25 = vadd.f32 %v778_v14, %v519_v24  ;;  %v799_v0 = vpop.f32.mrf.mxu3 }
 0x2fe   :  { %v862_v27 = vadd.f32 %v1335_v37, %v826_v25 }
 0x300   :  { %894 = vst [vmem:[%s1585_s6 + $0xc0] sm:$0xff] %v862_v27 }
 0x301   :  { %v521_v29 = vpop.f32.mrf.mxu2 }
 0x302   :  { %v522_v30 = vadd.f32 %v521_v29, %v408_v19 }
 0x304   :  { %v827_v31 = vadd.f32 %v781_v21, %v522_v30 }
 0x306   :  { %v863_v32 = vadd.f32 %v1335_v37, %v827_v31 }
 0x308   :  { %895 = vst [vmem:[%s1585_s6 + $0xc8] sm:$0xff] %v863_v32 }
 0x309   :  { %v524_v34 = vpop.f32.mrf.mxu2 }
 0x30a   :  { %v525_v36 = vadd.f32 %v524_v34, %v411_v26 }
 0x30c   :  { %v828_v38 = vadd.f32 %v784_v28, %v525_v36 }
 0x30e   :  { %v864_v39 = vadd.f32 %v1335_v37, %v828_v38 }
 0x310   :  { %896 = vst [vmem:[%s1585_s6 + $0xd0] sm:$0xff] %v864_v39 }
 0x311   :  { %v527_v40 = vpop.f32.mrf.mxu2 }
 0x312   :  { %v528_v42 = vadd.f32 %v527_v40, %v414_v33 }
 0x314   :  { %v829_v44 = vadd.f32 %v787_v35, %v528_v42 }
 0x316   :  { %v865_v45 = vadd.f32 %v1335_v37, %v829_v44 }
 0x318   :  { %897 = vst [vmem:[%s1585_s6 + $0xd8] sm:$0xff] %v865_v45 }
 0x319   :  { %v530_v46 = vpop.f32.mrf.mxu2 }
 0x31a   :  { %v531_v47 = vadd.f32 %v530_v46, %v417_v41 }
 0x31c   :  { %v830_v49 = vadd.f32 %v790_v43, %v531_v47 }
 0x31e   :  { %v866_v51 = vadd.f32 %v1335_v37, %v830_v49 }
 0x320   :  { %898 = vst [vmem:[%s1585_s6 + $0xe0] sm:$0xff] %v866_v51 }
 0x321   :  { %v533_v52 = vpop.f32.mrf.mxu2 }
 0x322   :  { %v534_v53 = vadd.f32 %v533_v52, %v420_v48 }
 0x324   :  { %v831_v54 = vadd.f32 %v793_v50, %v534_v53 }
 0x326   :  { %v867_v56 = vadd.f32 %v1335_v37, %v831_v54 }
 0x328   :  { %899 = vst [vmem:[%s1585_s6 + $0xe8] sm:$0xff] %v867_v56 }
 0x329   :  { %v536_v58 = vpop.f32.mrf.mxu2 }
 0x32a   :  { %v537_v59 = vadd.f32 %v536_v58, %v423_v55 }
 0x32c   :  { %v832_v60 = vadd.f32 %v796_v57, %v537_v59 }
 0x32e   :  { %v868_v61 = vadd.f32 %v1335_v37, %v832_v60 }
 0x330   :  { %900 = vst [vmem:[%s1585_s6 + $0xf0] sm:$0xff] %v868_v61 }
 0x331   :  { %v539_v63 = vpop.f32.mrf.mxu2 }
 0x332   :  { %v540_v1 = vadd.f32 %v539_v63, %v426_v62 }
 0x334   :  { %v833_v2 = vadd.f32 %v799_v0, %v540_v1 }
 0x336   :  { %v869_v3 = vadd.f32 %v1335_v37, %v833_v2 }
 0x338   :  { %901 = vst [vmem:[%s1585_s6 + $0xf8] sm:$0xff] %v869_v3 }

</bundles_post_ra>
